<compile_context>
chip_gen: v5e
topology: v5e:2x2
jax: 0.10.0
libtpu: 0.0.40
codegen_flags: <defaults>
</compile_context>

<pallas_src>
import functools

import jax
import jax.numpy as jnp
import numpy as np
from jax.experimental import pallas as pl
from jax.experimental.pallas import tpu as pltpu


def _tree_sum(parts):
    # Balanced add tree (breaks the serial accumulation chain).
    while len(parts) > 1:
        nxt = [parts[i] + parts[i + 1] for i in range(0, len(parts) - 1, 2)]
        if len(parts) % 2:
            nxt.append(parts[-1])
        parts = nxt
    return parts[0]


def resblock_kernel(x_ref, w1_ref, b1_ref, w2_ref, b2_ref, w3_ref, b3_ref,
                    mask_ref, out_ref, t1_ref, *, wp):
    """One batch element per grid step.

    x_ref   : (1, Cin, LX)        extended flat padded-input frame (bf16)
    w*_ref  : (9, Cout, Csrc)     BN-scale-folded conv weights (bf16)
    b*_ref  : (Cout, 1)           folded BN bias (f32)
    mask_ref: (1, LT1)            1.0 on interior pixels of the conv1 frame
    out_ref : (1, Cout, LOUT)     output frame, H rows x Wp cols (f32)
    t1_ref  : (Cout, LT1)         VMEM scratch for the conv1 activation frame
    """
    lt1 = t1_ref.shape[1]
    lout = out_ref.shape[2]

    def conv(load_window, w_ref, length):
        parts = []
        for t in range(9):
            ty, tx = divmod(t, 3)
            win = load_window(ty * wp + tx, length)          # (Csrc, length)
            parts.append(jnp.dot(w_ref[t], win,
                                 preferred_element_type=jnp.float32))
        return _tree_sum(parts)                              # (Cout, length) f32

    def x_window(start, length):
        return x_ref[0, :, pl.ds(start, length)]

    def t1_window(start, length):
        return t1_ref[:, pl.ds(start, length)]

    # conv1 -> bn1 -> relu over the full padded frame; the mask zeroes the
    # frame border so conv2 can consume it as an already-padded input.
    t1 = conv(x_window, w1_ref, lt1) + b1_ref[...]
    t1 = jnp.maximum(t1, 0.0) * mask_ref[...]
    t1_ref[...] = t1.astype(t1_ref.dtype)

    # main branch: conv2 -> bn2 ; residual branch: conv3 -> bn3 ; add ; relu.
    main = conv(t1_window, w2_ref, lout) + b2_ref[...]
    resid = conv(lambda s, l: x_window(s + wp + 1, l), w3_ref, lout) + b3_ref[...]
    out_ref[0] = jnp.maximum(main + resid, 0.0).astype(out_ref.dtype)


def resblock_forward(x, params, *, eps=1e-5, compute_dtype=jnp.bfloat16):
    N, c_in, H, W = x.shape
    c_out = params['w1'].shape[0]
    Hp, Wp = H + 2, W + 2
    lx = Hp * Wp + 2 * Wp + 4      # extended flat padded-input frame length
    lt1 = Hp * Wp + 2              # conv1 activation frame (+/-1 element slack)
    lout = H * Wp                  # output frame: H rows x Wp cols
    off = Wp + 2                   # offset of padded-frame index 0 inside lx

    # ---- host-side glue -----------------------------------------------------
    # zero-pad spatially, flatten row-major (width Wp), extend by `off` zeros on
    # both sides so every shifted 3x3 tap window is a contiguous in-bounds slice.
    xpad = jnp.pad(x, ((0, 0), (0, 0), (1, 1), (1, 1))).reshape(N, c_in, Hp * Wp)
    xbuf = jnp.pad(xpad, ((0, 0), (0, 0), (off, off))).astype(compute_dtype)

    def fold(w, b, bn):
        gamma, beta, mean, var = bn
        scale = gamma / jnp.sqrt(var + eps)                       # (Cout,)
        wmat = w * scale[:, None, None, None]                     # scale into W
        wmat = jnp.transpose(wmat, (2, 3, 0, 1)).reshape(9, w.shape[0], w.shape[1])
        bias = (b - mean) * scale + beta
        return wmat.astype(compute_dtype), bias.reshape(-1, 1).astype(jnp.float32)

    w1m, b1v = fold(params['w1'], params['b1'], params['bn1'])
    w2m, b2v = fold(params['w2'], params['b2'], params['bn2'])
    w3m, b3v = fold(params['w3'], params['b3'], params['bn3'])

    # Border mask for the conv1 activation frame (1.0 on interior pixels).
    q = np.arange(lt1) - 1
    interior = ((q // Wp >= 1) & (q // Wp <= H) & (q % Wp >= 1) & (q % Wp <= W))
    mask = jnp.asarray(interior.reshape(1, lt1).astype(np.float32))

    def rep_spec(*shape):          # grid-invariant (loaded once) VMEM operand
        return pl.BlockSpec(shape, lambda n, _s=shape: (0,) * len(_s))

    out_flat = pl.pallas_call(
        functools.partial(resblock_kernel, wp=Wp),
        out_shape=jax.ShapeDtypeStruct((N, c_out, lout), x.dtype),
        grid=(N,),
        in_specs=[
            pl.BlockSpec((1, c_in, lx), lambda n: (n, 0, 0)),
            rep_spec(9, c_out, c_in), rep_spec(c_out, 1),
            rep_spec(9, c_out, c_out), rep_spec(c_out, 1),
            rep_spec(9, c_out, c_in), rep_spec(c_out, 1),
            rep_spec(1, lt1),
        ],
        out_specs=pl.BlockSpec((1, c_out, lout), lambda n: (n, 0, 0)),
        scratch_shapes=[pltpu.VMEM((c_out, lt1), compute_dtype)],
        compiler_params=pltpu.CompilerParams(
            dimension_semantics=("parallel",)),
    )(xbuf, w1m, b1v, w2m, b2v, w3m, b3v, mask)

    # Drop the 2 junk columns per row: (N, Cout, H, Wp) -> (N, Cout, H, W).
    return out_flat.reshape(N, c_out, H, Wp)[:, :, :, 1:W + 1]


def init_params(key, c_in, c_out):
    """Deterministic synthetic params matching nn.Conv2d / nn.BatchNorm2d shapes."""
    ks = jax.random.split(key, 6)

    def conv_init(k, co, ci):
        bound = 1.0 / np.sqrt(ci * 9)
        kw, kb = jax.random.split(k)
        w = jax.random.uniform(kw, (co, ci, 3, 3), jnp.float32, -bound, bound)
        b = jax.random.uniform(kb, (co,), jnp.float32, -bound, bound)
        return w, b

    def bn_init(k, c):
        k1, k2, k3 = jax.random.split(k, 3)
        gamma = 1.0 + 0.1 * jax.random.normal(k1, (c,), jnp.float32)
        beta = 0.1 * jax.random.normal(k2, (c,), jnp.float32)
        mean = 0.1 * jax.random.normal(k3, (c,), jnp.float32)
        var = jnp.full((c,), 0.9, jnp.float32)
        return gamma, beta, mean, var

    w1, b1 = conv_init(ks[0], c_out, c_in)
    w2, b2 = conv_init(ks[1], c_out, c_out)
    w3, b3 = conv_init(ks[2], c_out, c_in)
    return {'w1': w1, 'b1': b1, 'bn1': bn_init(ks[3], c_out),
            'w2': w2, 'b2': b2, 'bn2': bn_init(ks[4], c_out),
            'w3': w3, 'b3': b3, 'bn3': bn_init(ks[5], c_out)}


def ref_forward(x, params, *, eps=1e-5, compute_dtype=jnp.float32):
    """Pure-JAX reference (PyTorch forward, eval-mode BN folded — exact).

    `compute_dtype` optionally rounds conv inputs to the kernel's MXU dtype so
    the bf16 kernel can also be validated with a tight tolerance.
    """
    qc = lambda a: a.astype(compute_dtype).astype(jnp.float32)

    def conv_bn(z, w, b, bn):
        gamma, beta, mean, var = bn
        scale = gamma / jnp.sqrt(var + eps)
        y = jax.lax.conv_general_dilated(
            qc(z), qc(w * scale[:, None, None, None]), (1, 1), ((1, 1), (1, 1)),
            dimension_numbers=('NCHW', 'OIHW', 'NCHW'),
            precision=jax.lax.Precision.HIGHEST)
        return y + ((b - mean) * scale + beta)[None, :, None, None]

    t1 = jnp.maximum(conv_bn(x, params['w1'], params['b1'], params['bn1']), 0.0)
    out = conv_bn(t1, params['w2'], params['b2'], params['bn2'])
    resid = conv_bn(x, params['w3'], params['b3'], params['bn3'])
    return jnp.maximum(out + resid, 0.0)


if __name__ == "__main__":
    key = jax.random.PRNGKey(0)
    kx, kp = jax.random.split(key)

    N, C, H, W = 2, 4, 16, 16                 # batch=2, channels=4, spatial=16
    x = jax.random.normal(kx, (N, C, H, W), jnp.float32)
    params = init_params(kp, C, C)

    out = jax.block_until_ready(resblock_forward(x, params))
    assert out.shape == (N, C, H, W)

    # Tight check vs. a reference that mirrors the kernel's bf16 MXU rounding.
    ref_bf16 = ref_forward(x, params, compute_dtype=jnp.bfloat16)
    np.testing.assert_allclose(np.asarray(out), np.asarray(ref_bf16),
                               rtol=1e-2, atol=1e-2)
    # Sanity check vs. the full-f32 reference (loose: bf16 MXU inputs).
    ref_f32 = ref_forward(x, params)
    np.testing.assert_allclose(np.asarray(out), np.asarray(ref_f32),
                               rtol=5e-2, atol=5e-2)
    print("KERNEL_OK")
</pallas_src>

<mosaic_0001>
module attributes {stable_mosaic.version = 11 : i64} {
  func.func @resblock_kernel(%arg0: i32, %arg1: memref<1x4x364xbf16, #tpu.memory_space<vmem>>, %arg2: memref<9x4x4xbf16, #tpu.memory_space<vmem>>, %arg3: memref<4x1xf32, #tpu.memory_space<vmem>>, %arg4: memref<9x4x4xbf16, #tpu.memory_space<vmem>>, %arg5: memref<4x1xf32, #tpu.memory_space<vmem>>, %arg6: memref<9x4x4xbf16, #tpu.memory_space<vmem>>, %arg7: memref<4x1xf32, #tpu.memory_space<vmem>>, %arg8: memref<1x326xf32, #tpu.memory_space<vmem>>, %arg9: memref<1x4x288xf32, #tpu.memory_space<vmem>>, %arg10: memref<4x326xbf16, #tpu.memory_space<vmem>>) attributes {dimension_semantics = [#tpu.dimension_semantics<parallel>], iteration_bounds = array<i64: 2>, scalar_prefetch = 0 : i64, scratch_operands = 1 : i64, tpu.core_type = #tpu.core_type<tc>, window_params = [{transform_indices = @transform_0, window_bounds = array<i64: 1, 4, 364>}, {pipeline_mode = #tpu.pipeline_mode<synchronous>, transform_indices = @transform_1, window_bounds = array<i64: 9, 4, 4>}, {pipeline_mode = #tpu.pipeline_mode<synchronous>, transform_indices = @transform_2, window_bounds = array<i64: 4, 1>}, {pipeline_mode = #tpu.pipeline_mode<synchronous>, transform_indices = @transform_3, window_bounds = array<i64: 9, 4, 4>}, {pipeline_mode = #tpu.pipeline_mode<synchronous>, transform_indices = @transform_4, window_bounds = array<i64: 4, 1>}, {pipeline_mode = #tpu.pipeline_mode<synchronous>, transform_indices = @transform_5, window_bounds = array<i64: 9, 4, 4>}, {pipeline_mode = #tpu.pipeline_mode<synchronous>, transform_indices = @transform_6, window_bounds = array<i64: 4, 1>}, {pipeline_mode = #tpu.pipeline_mode<synchronous>, transform_indices = @transform_7, window_bounds = array<i64: 1, 326>}, {transform_indices = @transform_8, window_bounds = array<i64: 1, 4, 288>}]} {
    %c0 = arith.constant 0 : index
    %c0_0 = arith.constant 0 : index
    %c0_1 = arith.constant 0 : index
    %0 = vector.load %arg1[%c0, %c0_0, %c0_1] : memref<1x4x364xbf16, #tpu.memory_space<vmem>>, vector<1x4x326xbf16>
    %1 = vector.shape_cast %0 : vector<1x4x326xbf16> to vector<4x326xbf16>
    %c0_2 = arith.constant 0 : index
    %c0_3 = arith.constant 0 : index
    %c0_4 = arith.constant 0 : index
    %2 = vector.load %arg2[%c0_2, %c0_3, %c0_4] : memref<9x4x4xbf16, #tpu.memory_space<vmem>>, vector<1x4x4xbf16>
    %3 = vector.shape_cast %2 : vector<1x4x4xbf16> to vector<4x4xbf16>
    %cst = arith.constant dense<0.000000e+00> : vector<4x326xf32>
    %4 = tpu.matmul %3, %1, %cst {dimension_numbers = #tpu.dot_dimension_numbers<[1], [0], [0], [1], [0, 0, 1, 1], [], []>} : vector<4x4xbf16>, vector<4x326xbf16>, vector<4x326xf32> -> vector<4x326xf32>
    %c0_5 = arith.constant 0 : index
    %c0_6 = arith.constant 0 : index
    %c1 = arith.constant 1 : index
    %5 = vector.load %arg1[%c0_5, %c0_6, %c1] : memref<1x4x364xbf16, #tpu.memory_space<vmem>>, vector<1x4x326xbf16>
    %6 = vector.shape_cast %5 : vector<1x4x326xbf16> to vector<4x326xbf16>
    %c1_7 = arith.constant 1 : index
    %c0_8 = arith.constant 0 : index
    %c0_9 = arith.constant 0 : index
    %7 = vector.load %arg2[%c1_7, %c0_8, %c0_9] : memref<9x4x4xbf16, #tpu.memory_space<vmem>>, vector<1x4x4xbf16>
    %8 = vector.shape_cast %7 : vector<1x4x4xbf16> to vector<4x4xbf16>
    %cst_10 = arith.constant dense<0.000000e+00> : vector<4x326xf32>
    %9 = tpu.matmul %8, %6, %cst_10 {dimension_numbers = #tpu.dot_dimension_numbers<[1], [0], [0], [1], [0, 0, 1, 1], [], []>} : vector<4x4xbf16>, vector<4x326xbf16>, vector<4x326xf32> -> vector<4x326xf32>
    %c0_11 = arith.constant 0 : index
    %c0_12 = arith.constant 0 : index
    %c2 = arith.constant 2 : index
    %10 = vector.load %arg1[%c0_11, %c0_12, %c2] : memref<1x4x364xbf16, #tpu.memory_space<vmem>>, vector<1x4x326xbf16>
    %11 = vector.shape_cast %10 : vector<1x4x326xbf16> to vector<4x326xbf16>
    %c2_13 = arith.constant 2 : index
    %c0_14 = arith.constant 0 : index
    %c0_15 = arith.constant 0 : index
    %12 = vector.load %arg2[%c2_13, %c0_14, %c0_15] : memref<9x4x4xbf16, #tpu.memory_space<vmem>>, vector<1x4x4xbf16>
    %13 = vector.shape_cast %12 : vector<1x4x4xbf16> to vector<4x4xbf16>
    %cst_16 = arith.constant dense<0.000000e+00> : vector<4x326xf32>
    %14 = tpu.matmul %13, %11, %cst_16 {dimension_numbers = #tpu.dot_dimension_numbers<[1], [0], [0], [1], [0, 0, 1, 1], [], []>} : vector<4x4xbf16>, vector<4x326xbf16>, vector<4x326xf32> -> vector<4x326xf32>
    %c0_17 = arith.constant 0 : index
    %c0_18 = arith.constant 0 : index
    %c18 = arith.constant 18 : index
    %15 = vector.load %arg1[%c0_17, %c0_18, %c18] : memref<1x4x364xbf16, #tpu.memory_space<vmem>>, vector<1x4x326xbf16>
    %16 = vector.shape_cast %15 : vector<1x4x326xbf16> to vector<4x326xbf16>
    %c3 = arith.constant 3 : index
    %c0_19 = arith.constant 0 : index
    %c0_20 = arith.constant 0 : index
    %17 = vector.load %arg2[%c3, %c0_19, %c0_20] : memref<9x4x4xbf16, #tpu.memory_space<vmem>>, vector<1x4x4xbf16>
    %18 = vector.shape_cast %17 : vector<1x4x4xbf16> to vector<4x4xbf16>
    %cst_21 = arith.constant dense<0.000000e+00> : vector<4x326xf32>
    %19 = tpu.matmul %18, %16, %cst_21 {dimension_numbers = #tpu.dot_dimension_numbers<[1], [0], [0], [1], [0, 0, 1, 1], [], []>} : vector<4x4xbf16>, vector<4x326xbf16>, vector<4x326xf32> -> vector<4x326xf32>
    %c0_22 = arith.constant 0 : index
    %c0_23 = arith.constant 0 : index
    %c19 = arith.constant 19 : index
    %20 = vector.load %arg1[%c0_22, %c0_23, %c19] : memref<1x4x364xbf16, #tpu.memory_space<vmem>>, vector<1x4x326xbf16>
    %21 = vector.shape_cast %20 : vector<1x4x326xbf16> to vector<4x326xbf16>
    %c4 = arith.constant 4 : index
    %c0_24 = arith.constant 0 : index
    %c0_25 = arith.constant 0 : index
    %22 = vector.load %arg2[%c4, %c0_24, %c0_25] : memref<9x4x4xbf16, #tpu.memory_space<vmem>>, vector<1x4x4xbf16>
    %23 = vector.shape_cast %22 : vector<1x4x4xbf16> to vector<4x4xbf16>
    %cst_26 = arith.constant dense<0.000000e+00> : vector<4x326xf32>
    %24 = tpu.matmul %23, %21, %cst_26 {dimension_numbers = #tpu.dot_dimension_numbers<[1], [0], [0], [1], [0, 0, 1, 1], [], []>} : vector<4x4xbf16>, vector<4x326xbf16>, vector<4x326xf32> -> vector<4x326xf32>
    %c0_27 = arith.constant 0 : index
    %c0_28 = arith.constant 0 : index
    %c20 = arith.constant 20 : index
    %25 = vector.load %arg1[%c0_27, %c0_28, %c20] : memref<1x4x364xbf16, #tpu.memory_space<vmem>>, vector<1x4x326xbf16>
    %26 = vector.shape_cast %25 : vector<1x4x326xbf16> to vector<4x326xbf16>
    %c5 = arith.constant 5 : index
    %c0_29 = arith.constant 0 : index
    %c0_30 = arith.constant 0 : index
    %27 = vector.load %arg2[%c5, %c0_29, %c0_30] : memref<9x4x4xbf16, #tpu.memory_space<vmem>>, vector<1x4x4xbf16>
    %28 = vector.shape_cast %27 : vector<1x4x4xbf16> to vector<4x4xbf16>
    %cst_31 = arith.constant dense<0.000000e+00> : vector<4x326xf32>
    %29 = tpu.matmul %28, %26, %cst_31 {dimension_numbers = #tpu.dot_dimension_numbers<[1], [0], [0], [1], [0, 0, 1, 1], [], []>} : vector<4x4xbf16>, vector<4x326xbf16>, vector<4x326xf32> -> vector<4x326xf32>
    %c0_32 = arith.constant 0 : index
    %c0_33 = arith.constant 0 : index
    %c36 = arith.constant 36 : index
    %30 = vector.load %arg1[%c0_32, %c0_33, %c36] : memref<1x4x364xbf16, #tpu.memory_space<vmem>>, vector<1x4x326xbf16>
    %31 = vector.shape_cast %30 : vector<1x4x326xbf16> to vector<4x326xbf16>
    %c6 = arith.constant 6 : index
    %c0_34 = arith.constant 0 : index
    %c0_35 = arith.constant 0 : index
    %32 = vector.load %arg2[%c6, %c0_34, %c0_35] : memref<9x4x4xbf16, #tpu.memory_space<vmem>>, vector<1x4x4xbf16>
    %33 = vector.shape_cast %32 : vector<1x4x4xbf16> to vector<4x4xbf16>
    %cst_36 = arith.constant dense<0.000000e+00> : vector<4x326xf32>
    %34 = tpu.matmul %33, %31, %cst_36 {dimension_numbers = #tpu.dot_dimension_numbers<[1], [0], [0], [1], [0, 0, 1, 1], [], []>} : vector<4x4xbf16>, vector<4x326xbf16>, vector<4x326xf32> -> vector<4x326xf32>
    %c0_37 = arith.constant 0 : index
    %c0_38 = arith.constant 0 : index
    %c37 = arith.constant 37 : index
    %35 = vector.load %arg1[%c0_37, %c0_38, %c37] : memref<1x4x364xbf16, #tpu.memory_space<vmem>>, vector<1x4x326xbf16>
    %36 = vector.shape_cast %35 : vector<1x4x326xbf16> to vector<4x326xbf16>
    %c7 = arith.constant 7 : index
    %c0_39 = arith.constant 0 : index
    %c0_40 = arith.constant 0 : index
    %37 = vector.load %arg2[%c7, %c0_39, %c0_40] : memref<9x4x4xbf16, #tpu.memory_space<vmem>>, vector<1x4x4xbf16>
    %38 = vector.shape_cast %37 : vector<1x4x4xbf16> to vector<4x4xbf16>
    %cst_41 = arith.constant dense<0.000000e+00> : vector<4x326xf32>
    %39 = tpu.matmul %38, %36, %cst_41 {dimension_numbers = #tpu.dot_dimension_numbers<[1], [0], [0], [1], [0, 0, 1, 1], [], []>} : vector<4x4xbf16>, vector<4x326xbf16>, vector<4x326xf32> -> vector<4x326xf32>
    %c0_42 = arith.constant 0 : index
    %c0_43 = arith.constant 0 : index
    %c38 = arith.constant 38 : index
    %40 = vector.load %arg1[%c0_42, %c0_43, %c38] : memref<1x4x364xbf16, #tpu.memory_space<vmem>>, vector<1x4x326xbf16>
    %41 = vector.shape_cast %40 : vector<1x4x326xbf16> to vector<4x326xbf16>
    %c8 = arith.constant 8 : index
    %c0_44 = arith.constant 0 : index
    %c0_45 = arith.constant 0 : index
    %42 = vector.load %arg2[%c8, %c0_44, %c0_45] : memref<9x4x4xbf16, #tpu.memory_space<vmem>>, vector<1x4x4xbf16>
    %43 = vector.shape_cast %42 : vector<1x4x4xbf16> to vector<4x4xbf16>
    %cst_46 = arith.constant dense<0.000000e+00> : vector<4x326xf32>
    %44 = tpu.matmul %43, %41, %cst_46 {dimension_numbers = #tpu.dot_dimension_numbers<[1], [0], [0], [1], [0, 0, 1, 1], [], []>} : vector<4x4xbf16>, vector<4x326xbf16>, vector<4x326xf32> -> vector<4x326xf32>
    %45 = arith.addf %4, %9 : vector<4x326xf32>
    %46 = arith.addf %14, %19 : vector<4x326xf32>
    %47 = arith.addf %24, %29 : vector<4x326xf32>
    %48 = arith.addf %34, %39 : vector<4x326xf32>
    %49 = arith.addf %45, %46 : vector<4x326xf32>
    %50 = arith.addf %47, %48 : vector<4x326xf32>
    %51 = arith.addf %49, %50 : vector<4x326xf32>
    %52 = arith.addf %51, %44 : vector<4x326xf32>
    %c0_47 = arith.constant 0 : index
    %c0_48 = arith.constant 0 : index
    %53 = vector.load %arg3[%c0_47, %c0_48] : memref<4x1xf32, #tpu.memory_space<vmem>>, vector<4x1xf32>
    %54 = vector.broadcast %53 : vector<4x1xf32> to vector<4x326xf32>
    %55 = arith.addf %52, %54 : vector<4x326xf32>
    %cst_49 = arith.constant 0.000000e+00 : f32
    %56 = vector.broadcast %cst_49 : f32 to vector<4x326xf32>
    %57 = arith.maximumf %55, %56 : vector<4x326xf32>
    %c0_50 = arith.constant 0 : index
    %c0_51 = arith.constant 0 : index
    %58 = vector.load %arg8[%c0_50, %c0_51] : memref<1x326xf32, #tpu.memory_space<vmem>>, vector<1x326xf32>
    %59 = vector.broadcast %58 : vector<1x326xf32> to vector<4x326xf32>
    %60 = arith.mulf %57, %59 : vector<4x326xf32>
    %61 = arith.truncf %60 : vector<4x326xf32> to vector<4x326xbf16>
    %c0_52 = arith.constant 0 : index
    %c0_53 = arith.constant 0 : index
    %62 = vector.load %arg10[%c0_52, %c0_53] : memref<4x326xbf16, #tpu.memory_space<vmem>>, vector<4x326xbf16>
    tpu.vector_store %arg10[%c0_52, %c0_53], %61 {strides = array<i32>} : memref<4x326xbf16, #tpu.memory_space<vmem>>, vector<4x326xbf16>,
    %c0_54 = arith.constant 0 : index
    %c0_55 = arith.constant 0 : index
    %63 = vector.load %arg10[%c0_54, %c0_55] : memref<4x326xbf16, #tpu.memory_space<vmem>>, vector<4x288xbf16>
    %c0_56 = arith.constant 0 : index
    %c0_57 = arith.constant 0 : index
    %c0_58 = arith.constant 0 : index
    %64 = vector.load %arg4[%c0_56, %c0_57, %c0_58] : memref<9x4x4xbf16, #tpu.memory_space<vmem>>, vector<1x4x4xbf16>
    %65 = vector.shape_cast %64 : vector<1x4x4xbf16> to vector<4x4xbf16>
    %cst_59 = arith.constant dense<0.000000e+00> : vector<4x288xf32>
    %66 = tpu.matmul %65, %63, %cst_59 {dimension_numbers = #tpu.dot_dimension_numbers<[1], [0], [0], [1], [0, 0, 1, 1], [], []>} : vector<4x4xbf16>, vector<4x288xbf16>, vector<4x288xf32> -> vector<4x288xf32>
    %c0_60 = arith.constant 0 : index
    %c1_61 = arith.constant 1 : index
    %67 = vector.load %arg10[%c0_60, %c1_61] : memref<4x326xbf16, #tpu.memory_space<vmem>>, vector<4x288xbf16>
    %c1_62 = arith.constant 1 : index
    %c0_63 = arith.constant 0 : index
    %c0_64 = arith.constant 0 : index
    %68 = vector.load %arg4[%c1_62, %c0_63, %c0_64] : memref<9x4x4xbf16, #tpu.memory_space<vmem>>, vector<1x4x4xbf16>
    %69 = vector.shape_cast %68 : vector<1x4x4xbf16> to vector<4x4xbf16>
    %cst_65 = arith.constant dense<0.000000e+00> : vector<4x288xf32>
    %70 = tpu.matmul %69, %67, %cst_65 {dimension_numbers = #tpu.dot_dimension_numbers<[1], [0], [0], [1], [0, 0, 1, 1], [], []>} : vector<4x4xbf16>, vector<4x288xbf16>, vector<4x288xf32> -> vector<4x288xf32>
    %c0_66 = arith.constant 0 : index
    %c2_67 = arith.constant 2 : index
    %71 = vector.load %arg10[%c0_66, %c2_67] : memref<4x326xbf16, #tpu.memory_space<vmem>>, vector<4x288xbf16>
    %c2_68 = arith.constant 2 : index
    %c0_69 = arith.constant 0 : index
    %c0_70 = arith.constant 0 : index
    %72 = vector.load %arg4[%c2_68, %c0_69, %c0_70] : memref<9x4x4xbf16, #tpu.memory_space<vmem>>, vector<1x4x4xbf16>
    %73 = vector.shape_cast %72 : vector<1x4x4xbf16> to vector<4x4xbf16>
    %cst_71 = arith.constant dense<0.000000e+00> : vector<4x288xf32>
    %74 = tpu.matmul %73, %71, %cst_71 {dimension_numbers = #tpu.dot_dimension_numbers<[1], [0], [0], [1], [0, 0, 1, 1], [], []>} : vector<4x4xbf16>, vector<4x288xbf16>, vector<4x288xf32> -> vector<4x288xf32>
    %c0_72 = arith.constant 0 : index
    %c18_73 = arith.constant 18 : index
    %75 = vector.load %arg10[%c0_72, %c18_73] : memref<4x326xbf16, #tpu.memory_space<vmem>>, vector<4x288xbf16>
    %c3_74 = arith.constant 3 : index
    %c0_75 = arith.constant 0 : index
    %c0_76 = arith.constant 0 : index
    %76 = vector.load %arg4[%c3_74, %c0_75, %c0_76] : memref<9x4x4xbf16, #tpu.memory_space<vmem>>, vector<1x4x4xbf16>
    %77 = vector.shape_cast %76 : vector<1x4x4xbf16> to vector<4x4xbf16>
    %cst_77 = arith.constant dense<0.000000e+00> : vector<4x288xf32>
    %78 = tpu.matmul %77, %75, %cst_77 {dimension_numbers = #tpu.dot_dimension_numbers<[1], [0], [0], [1], [0, 0, 1, 1], [], []>} : vector<4x4xbf16>, vector<4x288xbf16>, vector<4x288xf32> -> vector<4x288xf32>
    %c0_78 = arith.constant 0 : index
    %c19_79 = arith.constant 19 : index
    %79 = vector.load %arg10[%c0_78, %c19_79] : memref<4x326xbf16, #tpu.memory_space<vmem>>, vector<4x288xbf16>
    %c4_80 = arith.constant 4 : index
    %c0_81 = arith.constant 0 : index
    %c0_82 = arith.constant 0 : index
    %80 = vector.load %arg4[%c4_80, %c0_81, %c0_82] : memref<9x4x4xbf16, #tpu.memory_space<vmem>>, vector<1x4x4xbf16>
    %81 = vector.shape_cast %80 : vector<1x4x4xbf16> to vector<4x4xbf16>
    %cst_83 = arith.constant dense<0.000000e+00> : vector<4x288xf32>
    %82 = tpu.matmul %81, %79, %cst_83 {dimension_numbers = #tpu.dot_dimension_numbers<[1], [0], [0], [1], [0, 0, 1, 1], [], []>} : vector<4x4xbf16>, vector<4x288xbf16>, vector<4x288xf32> -> vector<4x288xf32>
    %c0_84 = arith.constant 0 : index
    %c20_85 = arith.constant 20 : index
    %83 = vector.load %arg10[%c0_84, %c20_85] : memref<4x326xbf16, #tpu.memory_space<vmem>>, vector<4x288xbf16>
    %c5_86 = arith.constant 5 : index
    %c0_87 = arith.constant 0 : index
    %c0_88 = arith.constant 0 : index
    %84 = vector.load %arg4[%c5_86, %c0_87, %c0_88] : memref<9x4x4xbf16, #tpu.memory_space<vmem>>, vector<1x4x4xbf16>
    %85 = vector.shape_cast %84 : vector<1x4x4xbf16> to vector<4x4xbf16>
    %cst_89 = arith.constant dense<0.000000e+00> : vector<4x288xf32>
    %86 = tpu.matmul %85, %83, %cst_89 {dimension_numbers = #tpu.dot_dimension_numbers<[1], [0], [0], [1], [0, 0, 1, 1], [], []>} : vector<4x4xbf16>, vector<4x288xbf16>, vector<4x288xf32> -> vector<4x288xf32>
    %c0_90 = arith.constant 0 : index
    %c36_91 = arith.constant 36 : index
    %87 = vector.load %arg10[%c0_90, %c36_91] : memref<4x326xbf16, #tpu.memory_space<vmem>>, vector<4x288xbf16>
    %c6_92 = arith.constant 6 : index
    %c0_93 = arith.constant 0 : index
    %c0_94 = arith.constant 0 : index
    %88 = vector.load %arg4[%c6_92, %c0_93, %c0_94] : memref<9x4x4xbf16, #tpu.memory_space<vmem>>, vector<1x4x4xbf16>
    %89 = vector.shape_cast %88 : vector<1x4x4xbf16> to vector<4x4xbf16>
    %cst_95 = arith.constant dense<0.000000e+00> : vector<4x288xf32>
    %90 = tpu.matmul %89, %87, %cst_95 {dimension_numbers = #tpu.dot_dimension_numbers<[1], [0], [0], [1], [0, 0, 1, 1], [], []>} : vector<4x4xbf16>, vector<4x288xbf16>, vector<4x288xf32> -> vector<4x288xf32>
    %c0_96 = arith.constant 0 : index
    %c37_97 = arith.constant 37 : index
    %91 = vector.load %arg10[%c0_96, %c37_97] : memref<4x326xbf16, #tpu.memory_space<vmem>>, vector<4x288xbf16>
    %c7_98 = arith.constant 7 : index
    %c0_99 = arith.constant 0 : index
    %c0_100 = arith.constant 0 : index
    %92 = vector.load %arg4[%c7_98, %c0_99, %c0_100] : memref<9x4x4xbf16, #tpu.memory_space<vmem>>, vector<1x4x4xbf16>
    %93 = vector.shape_cast %92 : vector<1x4x4xbf16> to vector<4x4xbf16>
    %cst_101 = arith.constant dense<0.000000e+00> : vector<4x288xf32>
    %94 = tpu.matmul %93, %91, %cst_101 {dimension_numbers = #tpu.dot_dimension_numbers<[1], [0], [0], [1], [0, 0, 1, 1], [], []>} : vector<4x4xbf16>, vector<4x288xbf16>, vector<4x288xf32> -> vector<4x288xf32>
    %c0_102 = arith.constant 0 : index
    %c38_103 = arith.constant 38 : index
    %95 = vector.load %arg10[%c0_102, %c38_103] : memref<4x326xbf16, #tpu.memory_space<vmem>>, vector<4x288xbf16>
    %c8_104 = arith.constant 8 : index
    %c0_105 = arith.constant 0 : index
    %c0_106 = arith.constant 0 : index
    %96 = vector.load %arg4[%c8_104, %c0_105, %c0_106] : memref<9x4x4xbf16, #tpu.memory_space<vmem>>, vector<1x4x4xbf16>
    %97 = vector.shape_cast %96 : vector<1x4x4xbf16> to vector<4x4xbf16>
    %cst_107 = arith.constant dense<0.000000e+00> : vector<4x288xf32>
    %98 = tpu.matmul %97, %95, %cst_107 {dimension_numbers = #tpu.dot_dimension_numbers<[1], [0], [0], [1], [0, 0, 1, 1], [], []>} : vector<4x4xbf16>, vector<4x288xbf16>, vector<4x288xf32> -> vector<4x288xf32>
    %99 = arith.addf %66, %70 : vector<4x288xf32>
    %100 = arith.addf %74, %78 : vector<4x288xf32>
    %101 = arith.addf %82, %86 : vector<4x288xf32>
    %102 = arith.addf %90, %94 : vector<4x288xf32>
    %103 = arith.addf %99, %100 : vector<4x288xf32>
    %104 = arith.addf %101, %102 : vector<4x288xf32>
    %105 = arith.addf %103, %104 : vector<4x288xf32>
    %106 = arith.addf %105, %98 : vector<4x288xf32>
    %c0_108 = arith.constant 0 : index
    %c0_109 = arith.constant 0 : index
    %107 = vector.load %arg5[%c0_108, %c0_109] : memref<4x1xf32, #tpu.memory_space<vmem>>, vector<4x1xf32>
    %108 = vector.broadcast %107 : vector<4x1xf32> to vector<4x288xf32>
    %109 = arith.addf %106, %108 : vector<4x288xf32>
    %c0_110 = arith.constant 0 : index
    %c0_111 = arith.constant 0 : index
    %c19_112 = arith.constant 19 : index
    %110 = vector.load %arg1[%c0_110, %c0_111, %c19_112] : memref<1x4x364xbf16, #tpu.memory_space<vmem>>, vector<1x4x288xbf16>
    %111 = vector.shape_cast %110 : vector<1x4x288xbf16> to vector<4x288xbf16>
    %c0_113 = arith.constant 0 : index
    %c0_114 = arith.constant 0 : index
    %c0_115 = arith.constant 0 : index
    %112 = vector.load %arg6[%c0_113, %c0_114, %c0_115] : memref<9x4x4xbf16, #tpu.memory_space<vmem>>, vector<1x4x4xbf16>
    %113 = vector.shape_cast %112 : vector<1x4x4xbf16> to vector<4x4xbf16>
    %cst_116 = arith.constant dense<0.000000e+00> : vector<4x288xf32>
    %114 = tpu.matmul %113, %111, %cst_116 {dimension_numbers = #tpu.dot_dimension_numbers<[1], [0], [0], [1], [0, 0, 1, 1], [], []>} : vector<4x4xbf16>, vector<4x288xbf16>, vector<4x288xf32> -> vector<4x288xf32>
    %c0_117 = arith.constant 0 : index
    %c0_118 = arith.constant 0 : index
    %c20_119 = arith.constant 20 : index
    %115 = vector.load %arg1[%c0_117, %c0_118, %c20_119] : memref<1x4x364xbf16, #tpu.memory_space<vmem>>, vector<1x4x288xbf16>
    %116 = vector.shape_cast %115 : vector<1x4x288xbf16> to vector<4x288xbf16>
    %c1_120 = arith.constant 1 : index
    %c0_121 = arith.constant 0 : index
    %c0_122 = arith.constant 0 : index
    %117 = vector.load %arg6[%c1_120, %c0_121, %c0_122] : memref<9x4x4xbf16, #tpu.memory_space<vmem>>, vector<1x4x4xbf16>
    %118 = vector.shape_cast %117 : vector<1x4x4xbf16> to vector<4x4xbf16>
    %cst_123 = arith.constant dense<0.000000e+00> : vector<4x288xf32>
    %119 = tpu.matmul %118, %116, %cst_123 {dimension_numbers = #tpu.dot_dimension_numbers<[1], [0], [0], [1], [0, 0, 1, 1], [], []>} : vector<4x4xbf16>, vector<4x288xbf16>, vector<4x288xf32> -> vector<4x288xf32>
    %c0_124 = arith.constant 0 : index
    %c0_125 = arith.constant 0 : index
    %c21 = arith.constant 21 : index
    %120 = vector.load %arg1[%c0_124, %c0_125, %c21] : memref<1x4x364xbf16, #tpu.memory_space<vmem>>, vector<1x4x288xbf16>
    %121 = vector.shape_cast %120 : vector<1x4x288xbf16> to vector<4x288xbf16>
    %c2_126 = arith.constant 2 : index
    %c0_127 = arith.constant 0 : index
    %c0_128 = arith.constant 0 : index
    %122 = vector.load %arg6[%c2_126, %c0_127, %c0_128] : memref<9x4x4xbf16, #tpu.memory_space<vmem>>, vector<1x4x4xbf16>
    %123 = vector.shape_cast %122 : vector<1x4x4xbf16> to vector<4x4xbf16>
    %cst_129 = arith.constant dense<0.000000e+00> : vector<4x288xf32>
    %124 = tpu.matmul %123, %121, %cst_129 {dimension_numbers = #tpu.dot_dimension_numbers<[1], [0], [0], [1], [0, 0, 1, 1], [], []>} : vector<4x4xbf16>, vector<4x288xbf16>, vector<4x288xf32> -> vector<4x288xf32>
    %c0_130 = arith.constant 0 : index
    %c0_131 = arith.constant 0 : index
    %c37_132 = arith.constant 37 : index
    %125 = vector.load %arg1[%c0_130, %c0_131, %c37_132] : memref<1x4x364xbf16, #tpu.memory_space<vmem>>, vector<1x4x288xbf16>
    %126 = vector.shape_cast %125 : vector<1x4x288xbf16> to vector<4x288xbf16>
    %c3_133 = arith.constant 3 : index
    %c0_134 = arith.constant 0 : index
    %c0_135 = arith.constant 0 : index
    %127 = vector.load %arg6[%c3_133, %c0_134, %c0_135] : memref<9x4x4xbf16, #tpu.memory_space<vmem>>, vector<1x4x4xbf16>
    %128 = vector.shape_cast %127 : vector<1x4x4xbf16> to vector<4x4xbf16>
    %cst_136 = arith.constant dense<0.000000e+00> : vector<4x288xf32>
    %129 = tpu.matmul %128, %126, %cst_136 {dimension_numbers = #tpu.dot_dimension_numbers<[1], [0], [0], [1], [0, 0, 1, 1], [], []>} : vector<4x4xbf16>, vector<4x288xbf16>, vector<4x288xf32> -> vector<4x288xf32>
    %c0_137 = arith.constant 0 : index
    %c0_138 = arith.constant 0 : index
    %c38_139 = arith.constant 38 : index
    %130 = vector.load %arg1[%c0_137, %c0_138, %c38_139] : memref<1x4x364xbf16, #tpu.memory_space<vmem>>, vector<1x4x288xbf16>
    %131 = vector.shape_cast %130 : vector<1x4x288xbf16> to vector<4x288xbf16>
    %c4_140 = arith.constant 4 : index
    %c0_141 = arith.constant 0 : index
    %c0_142 = arith.constant 0 : index
    %132 = vector.load %arg6[%c4_140, %c0_141, %c0_142] : memref<9x4x4xbf16, #tpu.memory_space<vmem>>, vector<1x4x4xbf16>
    %133 = vector.shape_cast %132 : vector<1x4x4xbf16> to vector<4x4xbf16>
    %cst_143 = arith.constant dense<0.000000e+00> : vector<4x288xf32>
    %134 = tpu.matmul %133, %131, %cst_143 {dimension_numbers = #tpu.dot_dimension_numbers<[1], [0], [0], [1], [0, 0, 1, 1], [], []>} : vector<4x4xbf16>, vector<4x288xbf16>, vector<4x288xf32> -> vector<4x288xf32>
    %c0_144 = arith.constant 0 : index
    %c0_145 = arith.constant 0 : index
    %c39 = arith.constant 39 : index
    %135 = vector.load %arg1[%c0_144, %c0_145, %c39] : memref<1x4x364xbf16, #tpu.memory_space<vmem>>, vector<1x4x288xbf16>
    %136 = vector.shape_cast %135 : vector<1x4x288xbf16> to vector<4x288xbf16>
    %c5_146 = arith.constant 5 : index
    %c0_147 = arith.constant 0 : index
    %c0_148 = arith.constant 0 : index
    %137 = vector.load %arg6[%c5_146, %c0_147, %c0_148] : memref<9x4x4xbf16, #tpu.memory_space<vmem>>, vector<1x4x4xbf16>
    %138 = vector.shape_cast %137 : vector<1x4x4xbf16> to vector<4x4xbf16>
    %cst_149 = arith.constant dense<0.000000e+00> : vector<4x288xf32>
    %139 = tpu.matmul %138, %136, %cst_149 {dimension_numbers = #tpu.dot_dimension_numbers<[1], [0], [0], [1], [0, 0, 1, 1], [], []>} : vector<4x4xbf16>, vector<4x288xbf16>, vector<4x288xf32> -> vector<4x288xf32>
    %c0_150 = arith.constant 0 : index
    %c0_151 = arith.constant 0 : index
    %c55 = arith.constant 55 : index
    %140 = vector.load %arg1[%c0_150, %c0_151, %c55] : memref<1x4x364xbf16, #tpu.memory_space<vmem>>, vector<1x4x288xbf16>
    %141 = vector.shape_cast %140 : vector<1x4x288xbf16> to vector<4x288xbf16>
    %c6_152 = arith.constant 6 : index
    %c0_153 = arith.constant 0 : index
    %c0_154 = arith.constant 0 : index
    %142 = vector.load %arg6[%c6_152, %c0_153, %c0_154] : memref<9x4x4xbf16, #tpu.memory_space<vmem>>, vector<1x4x4xbf16>
    %143 = vector.shape_cast %142 : vector<1x4x4xbf16> to vector<4x4xbf16>
    %cst_155 = arith.constant dense<0.000000e+00> : vector<4x288xf32>
    %144 = tpu.matmul %143, %141, %cst_155 {dimension_numbers = #tpu.dot_dimension_numbers<[1], [0], [0], [1], [0, 0, 1, 1], [], []>} : vector<4x4xbf16>, vector<4x288xbf16>, vector<4x288xf32> -> vector<4x288xf32>
    %c0_156 = arith.constant 0 : index
    %c0_157 = arith.constant 0 : index
    %c56 = arith.constant 56 : index
    %145 = vector.load %arg1[%c0_156, %c0_157, %c56] : memref<1x4x364xbf16, #tpu.memory_space<vmem>>, vector<1x4x288xbf16>
    %146 = vector.shape_cast %145 : vector<1x4x288xbf16> to vector<4x288xbf16>
    %c7_158 = arith.constant 7 : index
    %c0_159 = arith.constant 0 : index
    %c0_160 = arith.constant 0 : index
    %147 = vector.load %arg6[%c7_158, %c0_159, %c0_160] : memref<9x4x4xbf16, #tpu.memory_space<vmem>>, vector<1x4x4xbf16>
    %148 = vector.shape_cast %147 : vector<1x4x4xbf16> to vector<4x4xbf16>
    %cst_161 = arith.constant dense<0.000000e+00> : vector<4x288xf32>
    %149 = tpu.matmul %148, %146, %cst_161 {dimension_numbers = #tpu.dot_dimension_numbers<[1], [0], [0], [1], [0, 0, 1, 1], [], []>} : vector<4x4xbf16>, vector<4x288xbf16>, vector<4x288xf32> -> vector<4x288xf32>
    %c0_162 = arith.constant 0 : index
    %c0_163 = arith.constant 0 : index
    %c57 = arith.constant 57 : index
    %150 = vector.load %arg1[%c0_162, %c0_163, %c57] : memref<1x4x364xbf16, #tpu.memory_space<vmem>>, vector<1x4x288xbf16>
    %151 = vector.shape_cast %150 : vector<1x4x288xbf16> to vector<4x288xbf16>
    %c8_164 = arith.constant 8 : index
    %c0_165 = arith.constant 0 : index
    %c0_166 = arith.constant 0 : index
    %152 = vector.load %arg6[%c8_164, %c0_165, %c0_166] : memref<9x4x4xbf16, #tpu.memory_space<vmem>>, vector<1x4x4xbf16>
    %153 = vector.shape_cast %152 : vector<1x4x4xbf16> to vector<4x4xbf16>
    %cst_167 = arith.constant dense<0.000000e+00> : vector<4x288xf32>
    %154 = tpu.matmul %153, %151, %cst_167 {dimension_numbers = #tpu.dot_dimension_numbers<[1], [0], [0], [1], [0, 0, 1, 1], [], []>} : vector<4x4xbf16>, vector<4x288xbf16>, vector<4x288xf32> -> vector<4x288xf32>
    %155 = arith.addf %114, %119 : vector<4x288xf32>
    %156 = arith.addf %124, %129 : vector<4x288xf32>
    %157 = arith.addf %134, %139 : vector<4x288xf32>
    %158 = arith.addf %144, %149 : vector<4x288xf32>
    %159 = arith.addf %155, %156 : vector<4x288xf32>
    %160 = arith.addf %157, %158 : vector<4x288xf32>
    %161 = arith.addf %159, %160 : vector<4x288xf32>
    %162 = arith.addf %161, %154 : vector<4x288xf32>
    %c0_168 = arith.constant 0 : index
    %c0_169 = arith.constant 0 : index
    %163 = vector.load %arg7[%c0_168, %c0_169] : memref<4x1xf32, #tpu.memory_space<vmem>>, vector<4x1xf32>
    %164 = vector.broadcast %163 : vector<4x1xf32> to vector<4x288xf32>
    %165 = arith.addf %162, %164 : vector<4x288xf32>
    %166 = arith.addf %109, %165 : vector<4x288xf32>
    %cst_170 = arith.constant 0.000000e+00 : f32
    %167 = vector.broadcast %cst_170 : f32 to vector<4x288xf32>
    %168 = arith.maximumf %166, %167 : vector<4x288xf32>
    %c0_171 = arith.constant 0 : index
    %c0_172 = arith.constant 0 : index
    %c0_173 = arith.constant 0 : index
    %169 = vector.load %arg9[%c0_171, %c0_172, %c0_173] : memref<1x4x288xf32, #tpu.memory_space<vmem>>, vector<1x4x288xf32>
    %170 = vector.shape_cast %169 : vector<1x4x288xf32> to vector<4x288xf32>
    %171 = vector.shape_cast %168 : vector<4x288xf32> to vector<1x4x288xf32>
    tpu.vector_store %arg9[%c0_171, %c0_172, %c0_173], %171 {strides = array<i32>} : memref<1x4x288xf32, #tpu.memory_space<vmem>>, vector<1x4x288xf32>,
    return
  }
  func.func @transform_0(%arg0: i32) -> (i32, i32, i32) {
    %c0_i32 = arith.constant 0 : i32
    %c0_i32_0 = arith.constant 0 : i32
    %c0_i32_1 = arith.constant 0 : i32
    return %arg0, %c0_i32, %c0_i32_0 : i32, i32, i32
  }
  func.func @transform_1(%arg0: i32) -> (i32, i32, i32) {
    %c0_i32 = arith.constant 0 : i32
    %c0_i32_0 = arith.constant 0 : i32
    %c0_i32_1 = arith.constant 0 : i32
    %c0_i32_2 = arith.constant 0 : i32
    return %c0_i32, %c0_i32_0, %c0_i32_1 : i32, i32, i32
  }
  func.func @transform_2(%arg0: i32) -> (i32, i32) {
    %c0_i32 = arith.constant 0 : i32
    %c0_i32_0 = arith.constant 0 : i32
    %c0_i32_1 = arith.constant 0 : i32
    return %c0_i32, %c0_i32_0 : i32, i32
  }
  func.func @transform_3(%arg0: i32) -> (i32, i32, i32) {
    %c0_i32 = arith.constant 0 : i32
    %c0_i32_0 = arith.constant 0 : i32
    %c0_i32_1 = arith.constant 0 : i32
    %c0_i32_2 = arith.constant 0 : i32
    return %c0_i32, %c0_i32_0, %c0_i32_1 : i32, i32, i32
  }
  func.func @transform_4(%arg0: i32) -> (i32, i32) {
    %c0_i32 = arith.constant 0 : i32
    %c0_i32_0 = arith.constant 0 : i32
    %c0_i32_1 = arith.constant 0 : i32
    return %c0_i32, %c0_i32_0 : i32, i32
  }
  func.func @transform_5(%arg0: i32) -> (i32, i32, i32) {
    %c0_i32 = arith.constant 0 : i32
    %c0_i32_0 = arith.constant 0 : i32
    %c0_i32_1 = arith.constant 0 : i32
    %c0_i32_2 = arith.constant 0 : i32
    return %c0_i32, %c0_i32_0, %c0_i32_1 : i32, i32, i32
  }
  func.func @transform_6(%arg0: i32) -> (i32, i32) {
    %c0_i32 = arith.constant 0 : i32
    %c0_i32_0 = arith.constant 0 : i32
    %c0_i32_1 = arith.constant 0 : i32
    return %c0_i32, %c0_i32_0 : i32, i32
  }
  func.func @transform_7(%arg0: i32) -> (i32, i32) {
    %c0_i32 = arith.constant 0 : i32
    %c0_i32_0 = arith.constant 0 : i32
    %c0_i32_1 = arith.constant 0 : i32
    return %c0_i32, %c0_i32_0 : i32, i32
  }
  func.func @transform_8(%arg0: i32) -> (i32, i32, i32) {
    %c0_i32 = arith.constant 0 : i32
    %c0_i32_0 = arith.constant 0 : i32
    %c0_i32_1 = arith.constant 0 : i32
    return %arg0, %c0_i32, %c0_i32_0 : i32, i32, i32
  }
}

</mosaic_0001>

<bundles_post_ra>
// kernel: tpu_custom_call.1
= control target key start
LH: loop header
LB: loop body
LE: loop exit
PB: predicated region body
PF: predicated region fallthrough
CT: control target
= control target key end

     0   :  { %13 = vsyncpa [#allocation4], 0  ;;  %s3179_s0 = inlined_call_operand.vmem [shape: bf16[2,4,364], index: 0, kind: input, shape index: {}]   ;;  %s3180_s1 = inlined_call_operand.vmem [shape: bf16[9,4,4], index: 1, kind: input, shape index: {}]   ;;  %s3181_s2 = inlined_call_operand.vmem [shape: f32[4,1], index: 2, kind: input, shape index: {}]   ;;  %s3182_s3 = inlined_call_operand.vmem [shape: bf16[9,4,4], index: 3, kind: input, shape index: {}]   ;;  %s3183_s4 = inlined_call_operand.vmem [shape: f32[4,1], index: 4, kind: input, shape index: {}]   ;;  %s3184_s5 = inlined_call_operand.vmem [shape: bf16[9,4,4], index: 5, kind: input, shape index: {}]   ;;  %s3185_s6 = inlined_call_operand.vmem [shape: f32[4,1], index: 6, kind: input, shape index: {}]   ;;  %s3186_s7 = inlined_call_operand.vmem [shape: f32[1,326], index: 7, kind: input, shape index: {}]   ;;  %s3187_s8 = inlined_call_operand.hbm [shape: f32[2,4,288], index: 8, kind: output, shape index: {}]  }
   0x1   :  { %15 = vsyncpa [#allocation4 + $0x1], 0  ;;  %s2638_s27 = smov 0   ;;  %s2640_s28 = smov 0  }
   0x2   :  { %s2642_s29 = smov 0   ;;  %s2644_s30 = smov 0  }
   0x3 LB: > { %s2659_s9 = sadd.s32 4294967295, %s2577_s30   ;;  %s2344_s10 = sadd.s32 4294967294, %s2577_s30   ;;  %s2577_s30 = sphi %s2644_s30, %s3193_s30   ;;  %s2573_s29 = sphi %s2642_s29, %s3192_s29   ;;  %s2569_s28 = sphi %s2640_s28, %s3191_s28   ;;  %s2565_s27 = sphi %s2638_s27, %s3190_s27  }
   0x4   : > { %s2663_s11 = sadd.s32 1, %s2577_s30   ;;  %s201_s12 = sadd.s32 1, %s2573_s29 }
   0x5   : > { %s198_s13 = ssub.s32 %s2577_s30, %s2663_s11  ;;  %p211_p0 = scmp.ne.s32.totalorder %s2573_s29, %s2569_s28 }
   0x6   : > { %p199_p1 = scmp.eq.s32.totalorder %s198_s13, 0  ;;  %p212_p2 = scmp.eq.s32.totalorder %s2659_s9, 1 }
   0x7   : > { %p217_p3 = scmp.ne.s32.totalorder %s2569_s28, %s2565_s27  ;;  %p218_p4 = scmp.eq.s32.totalorder %s2344_s10, 1 }
   0x8   : > { %s2674_s14 = scalar_select %p199_p1, %s2573_s29, %s201_s12  }
   0x9   : > { %p2676_p5 = por %p212_p2, %p211_p0  ;;  %p2680_p6 = por %p218_p4, %p217_p3 }
   0xa   : > { %p2347_p7 = scmp.ge.s32.totalorder %s2577_s30, 1  ;;  %p265_p8 = scmp.lt.s32.totalorder %s2577_s30, 3 }
   0xc   : > { %p266_p9 = pnand %p2347_p7, %p265_p8 }
   0xd   : > { %p299_p10 = scmp.lt.s32.totalorder (!%p266_p9), %s2659_s9, 1  ;;  %s2579_s22 = smov (!%p266_p9), 127  }
   0xe   : > { %269 = sbr.rel (%p266_p9) target bundleno = 901 (0x385), region = 52  ;;  %s2580_s23 = smov (!%p266_p9), 110  }
   0xf   : > { %s2581_s24 = smov (!%p266_p9), 108   ;;  %s2582_s25 = smov (!%p266_p9), 91  }
  0x10   : > { %s2583_s26 = smov (!%p266_p9), 90   ;;  %s2584_s10 = smov (!%p266_p9), 126  }
  0x11   : > { %s2585_s12 = smov (!%p266_p9), 109   ;;  %s2586_s13 = smov (!%p266_p9), 92  }
  0x12   : > { %s2591_s19 = smov (!%p266_p9), 107  }
  0x13   : > { %s300_s17 = scalar_select %p299_p10, %s2659_s9, 1  ;;  %vm330_vm0 = vcmask 1041408   ;;  %vm323_vm1 = vcmask 1039360   ;;  %v2349_v38 = vld [vmem:[%s3180_s1 + $0x2] sm:$0x3]  ;;  %vm326_vm2 = vcmask 31744  }
  0x14   : > { %vm398_vm3 = vcmask 900096   ;;  %v2354_v46 = vld [vmem:[%s3180_s1 + $0x6] sm:$0x3]  ;;  %vm471_vm4 = vcmask 883712   ;;  %v2359_v58 = vld [vmem:[%s3180_s1 + $0xa] sm:$0x3] }
  0x15   : > { %s2458_s18 = smul.u32 6, %s300_s17  ;;  %vm544_vm5 = vcmask 744448   ;;  %vm615_vm6 = vcmask 736256   ;;  %vm734_vm7 = vcmask 1031168   ;;  %vm801_vm8 = vcmask 891904   ;;  %s2592_s17 = smov 73  }
  0x16   : > { %vm868_vm9 = vcmask 752640   ;;  %vm974_vm10 = vcmask 1043458   ;;  %vm976_vm12 = vcmask 570372   ;;  %vm967_vm13 = vcmask 1045508  }
  0x17   : > { %s2691_s21 = scalar_lea.vmem %s3179_s0, %s2458_s18  ;;  %vm975_vm11 = vmor %vm974_vm10, %vm330_vm0  ;;  %vm971_vm14 = vcmask 1043456  }
  0x18   : > { %v305_v0 = vld [vmem:[%s2691_s21] sm:$0x3f]  ;;  %vm977_vm15 = vmor %vm976_vm12, %vm975_vm11 }
  0x19   : > { %310 = vst [vmem:[#allocation1] ss:$4 sm:$0xff] %v305_v0  ;;  %v379_v1 = vld [vmem:[%s2691_s21] sm:$0x3f] }
  0x1a   : > { %v452_v5 = vld [vmem:[%s2691_s21] sm:$0x3f] }
  0x1b   : > { %v525_v9 = vld [vmem:[%s2691_s21] sm:$0x3f] }
  0x1c   : > { %v598_v13 = vld [vmem:[%s2691_s21] sm:$0x3f] }
  0x20   : > { %v315_v2 = vld.sshfl [vmem:[#allocation1 + $0x10] sm:$0xff pattern:$0x73625140]  ;;  %v313_v3 = vld.sshfl [vmem:[#allocation1 + $0x8] sm:$0xff pattern:$0x73625140] }
  0x21   : > { %321 = vrot.lane.b32.xlu0 %v315_v2, %s2579_s22  ;;  %319 = vrot.lane.b32.xlu1 %v313_v3, %s2579_s22  ;;  %v311_v4 = vld.sshfl [vmem:[#allocation1] sm:$0xff pattern:$0x73625140] }
  0x22   : > { %385 = vst [vmem:[#allocation1] ss:$4 sm:$0xff] %v379_v1 }
  0x29   : > { %317 = vrot.lane.b32.xlu0 %v311_v4, %s2579_s22  ;;  %v386_v6 = vld.sshfl [vmem:[#allocation1] sm:$0xff pattern:$0x73625140]  ;;  %v388_v7 = vld.sshfl [vmem:[#allocation1 + $0x8] sm:$0xff pattern:$0x73625140] }
  0x2a   : > { %392 = vrot.lane.b32.xlu1 %v386_v6, %s2580_s23  ;;  %v390_v8 = vld.sshfl [vmem:[#allocation1 + $0x10] sm:$0xff pattern:$0x73625140]  ;;  %394 = vrot.lane.b32.xlu2 %v388_v7, %s2580_s23 }
  0x2b   : > { %458 = vst [vmem:[#allocation1] ss:$4 sm:$0xff] %v452_v5 }
  0x32   : > { %396 = vrot.lane.b32.xlu1 %v390_v8, %s2580_s23  ;;  %v461_v10 = vld.sshfl [vmem:[#allocation1 + $0x8] sm:$0xff pattern:$0x73625140]  ;;  %v463_v11 = vld.sshfl [vmem:[#allocation1 + $0x10] sm:$0xff pattern:$0x73625140] }
  0x33   : > { %467 = vrot.lane.b32.xlu0 %v461_v10, %s2581_s24  ;;  %v459_v12 = vld.sshfl [vmem:[#allocation1] sm:$0xff pattern:$0x73625140] }
  0x34   : > { %531 = vst [vmem:[#allocation1] ss:$4 sm:$0xff] %v525_v9  ;;  %465 = vrot.lane.b32.xlu2 %v459_v12, %s2581_s24 }
  0x3b   : > { %v536_v14 = vld.sshfl [vmem:[#allocation1 + $0x10] sm:$0xff pattern:$0x73625140]  ;;  %v532_v15 = vld.sshfl [vmem:[#allocation1] sm:$0xff pattern:$0x73625140] }
  0x3c   : > { %542 = vrot.lane.b32.xlu1 %v536_v14, %s2582_s25  ;;  %v534_v16 = vld.sshfl [vmem:[#allocation1 + $0x8] sm:$0xff pattern:$0x73625140]  ;;  %469 = vrot.lane.b32.xlu2 %v463_v11, %s2581_s24 }
  0x3d   : > { %540 = vrot.lane.b32.xlu0 %v534_v16, %s2582_s25  ;;  %602 = vst [vmem:[#allocation1] ss:$4 sm:$0xff] %v598_v13 }
  0x44   : > { %v607_v17 = vld.sshfl [vmem:[#allocation1 + $0x10] sm:$0xff pattern:$0x73625140]  ;;  %v605_v18 = vld.sshfl [vmem:[#allocation1 + $0x8] sm:$0xff pattern:$0x73625140]  ;;  %538 = vrot.lane.b32.xlu2 %v532_v15, %s2582_s25 }
  0x45   : > { %613 = vrot.lane.b32.xlu0 %v607_v17, %s2583_s26  ;;  %v603_v19 = vld.sshfl [vmem:[#allocation1] sm:$0xff pattern:$0x73625140]  ;;  %v2368_v15 = vld [vmem:[%s3180_s1 + $0x10] sm:$0x3] }
  0x46   : > { %609 = vrot.lane.b32.xlu1 %v603_v19, %s2583_s26  ;;  %669 = vst [vmem:[#allocation1] ss:$4 sm:$0xff] %v305_v0 }
  0x4c   : > { %611 = vrot.lane.b32.xlu2 %v605_v18, %s2583_s26 }
  0x4d   : > { %v2713_v20 = vld.sshfl [vmem:[#allocation1] sm:$0xff pattern:$0x73625140]  ;;  %v2715_v21 = vld.sshfl [vmem:[#allocation1 + $0x8] sm:$0xff pattern:$0x73625140] }
  0x4e   : > { %v2717_v22 = vld.sshfl [vmem:[#allocation1 + $0x10] sm:$0xff pattern:$0x73625140]  ;;  %v678_v14 = vsel %vm330_vm0, %v2715_v21, 0 }
  0x4f   : > { %721 = vst [vmem:[#allocation1] ss:$4 sm:$0xff] %v379_v1  ;;  %v676_v1 = vsel %vm330_vm0, %v2713_v20, 0  ;;  %v680_v12 = vsel %vm330_vm0, %v2717_v22, 0 }
  0x56   : > { %v724_v23 = vld.sshfl [vmem:[#allocation1 + $0x8] sm:$0xff pattern:$0x73625140]  ;;  %v726_v24 = vld.sshfl [vmem:[#allocation1 + $0x10] sm:$0xff pattern:$0x73625140] }
  0x57   : > { %730 = vrot.lane.b32.xlu1 %v724_v23, %s2584_s10  ;;  %v722_v25 = vld.sshfl [vmem:[#allocation1] sm:$0xff pattern:$0x73625140]  ;;  %732 = vrot.lane.b32.xlu2 %v726_v24, %s2584_s10 }
  0x58   : > { %728 = vrot.lane.b32.xlu0 %v722_v25, %s2584_s10  ;;  %788 = vst [vmem:[#allocation1] ss:$4 sm:$0xff] %v452_v5  ;;  %v2364_v5 = vld [vmem:[%s3180_s1 + $0xe] sm:$0x3]  ;;  %v306_v23 = vld [vmem:[%s3180_s1] sm:$0x3] }
  0x5f   : > { %v793_v26 = vld.sshfl [vmem:[#allocation1 + $0x10] sm:$0xff pattern:$0x73625140]  ;;  %v789_v27 = vld.sshfl [vmem:[#allocation1] sm:$0xff pattern:$0x73625140] }
  0x60   : > { %799 = vrot.lane.b32.xlu1 %v793_v26, %s2585_s12  ;;  %v791_v28 = vld.sshfl [vmem:[#allocation1 + $0x8] sm:$0xff pattern:$0x73625140]  ;;  %795 = vrot.lane.b32.xlu2 %v789_v27, %s2585_s12 }
  0x61   : > { %797 = vrot.lane.b32.xlu0 %v791_v28, %s2585_s12  ;;  %855 = vst [vmem:[#allocation1] ss:$4 sm:$0xff] %v525_v9 }
  0x68   : > { %v860_v29 = vld.sshfl [vmem:[#allocation1 + $0x10] sm:$0xff pattern:$0x73625140]  ;;  %v856_v30 = vld.sshfl [vmem:[#allocation1] sm:$0xff pattern:$0x73625140] }
  0x69   : > { %866 = vrot.lane.b32.xlu0 %v860_v29, %s2586_s13  ;;  %862 = vrot.lane.b32.xlu1 %v856_v30, %s2586_s13  ;;  %v858_v31 = vld.sshfl [vmem:[#allocation1 + $0x8] sm:$0xff pattern:$0x73625140] }
  0x6a   : > { %864 = vrot.lane.b32.xlu2 %v858_v31, %s2586_s13 }
  0x84   : > { %v395_v32 = vpop.permute.xlu2 %394 }
  0x8e   : > { %v466_v39 = vpop.permute.xlu2 %465 }
  0x93   : > { %v322_v33 = vpop.permute.xlu0 %321  ;;  %v320_v34 = vpop.permute.xlu1 %319 }
  0x94   : > { %v338_v35 = vsel %vm330_vm0, %v322_v33, 0  ;;  %v325_v36 = vsel %vm323_vm1, %v320_v34, %v322_v33  ;;  %v2353_v33 = vld [vmem:[%s3180_s1 + $0x4] sm:$0x3] }
  0x95   : > { %373 = vmatpush.bf16.msra.mxu2 %v338_v35  ;;  %v335_v37 = vsel %vm330_vm0, %v325_v36, 0 }
  0x96   : > { %360 = vmatpush.bf16.msra.mxu1 %v335_v37  ;;  %v470_v47 = vpop.permute.xlu2 %469 }
  0x97   : > { %v484_v52 = vsel %vm330_vm0, %v470_v47, 0 }
  0x98   : > { %2352 = vmatmul.msk.bf16.vlgmr.msra.gmra.mxu2 %vm326_vm2, %v2349_v38 }
  0x99   : > { %2351 = vmatmul.msk.bf16.vlgmr.msra.gmra.mxu1 %vm326_vm2, %v2349_v38 }
  0x9b   : > { %v318_v40 = vpop.permute.xlu0 %317 }
  0x9c   : > { %v393_v41 = vpop.permute.xlu1 %392  ;;  %v324_v42 = vsel %vm323_vm1, %v318_v40, %v320_v34 }
  0x9d   : > { %v332_v43 = vsel %vm330_vm0, %v324_v42, 0  ;;  %v399_v44 = vsel %vm398_vm3, %v393_v41, %v395_v32  ;;  %v934_v42 = vld [vmem:[%s3181_s2] sm:$0xf] }
  0x9e   : > { %347 = vmatpush.bf16.msra.mxu0 %v332_v43  ;;  %v405_v45 = vsel %vm330_vm0, %v399_v44, 0  ;;  %v539_v59 = vpop.permute.xlu2 %538  ;;  %v2587_v43 = vmov 0   ;;  %v2358_v44 = vld [vmem:[%s3180_s1 + $0x8] sm:$0x3] }
  0x9f   : > { %420 = vmatpush.bf16.msra.mxu3 %v405_v45  ;;  %2513 = vset.pattern.permute.xlu0 %v2587_v43  ;;  %v2363_v45 = vld [vmem:[%s3180_s1 + $0xc] sm:$0x3] }
  0xa0   : > { %2514 = vset.pattern.permute.xlu2 %v2587_v43  ;;  %937 = vperm.xlu0 %2513, %v934_v42  }
  0xa1   : > { %2350 = vmatmul.msk.bf16.vlgmr.msra.gmra.mxu0 %vm326_vm2, %v2349_v38 }
  0xa2   : > { %2355 = vmatmul.msk.bf16.vlgmr.msra.gmra.mxu3 %vm326_vm2, %v2354_v46 }
  0xa4   : > { %v397_v48 = vpop.permute.xlu1 %396 }
  0xa5   : > { %v468_v49 = vpop.permute.xlu0 %467  ;;  %v400_v50 = vsel %vm398_vm3, %v395_v32, %v397_v48  ;;  %v411_v51 = vsel %vm330_vm0, %v397_v48, 0 }
  0xa6   : > { %v408_v53 = vsel %vm330_vm0, %v400_v50, 0  ;;  %446 = vmatpush.bf16.msrb.mxu1 %v411_v51  ;;  %v472_v54 = vsel %vm471_vm4, %v466_v39, %v468_v49  ;;  %v473_v55 = vsel %vm471_vm4, %v468_v49, %v470_v47  ;;  %v612_v4 = vpop.permute.xlu2 %611 }
  0xa7   : > { %433 = vmatpush.bf16.msrb.mxu0 %v408_v53  ;;  %v478_v56 = vsel %vm330_vm0, %v472_v54, 0  ;;  %v481_v57 = vsel %vm330_vm0, %v473_v55, 0 }
  0xa8   : > { %493 = vmatpush.bf16.msrb.mxu2 %v478_v56  ;;  %506 = vmatpush.bf16.msrb.mxu3 %v481_v57 }
  0xa9   : > { %2357 = vmatmul.msk.bf16.vlgmr.msrb.gmra.mxu1 %vm326_vm2, %v2354_v46 }
  0xab   : > { %519 = vmatpush.bf16.msra.mxu0 %v484_v52  ;;  %2360 = vmatmul.msk.bf16.vlgmr.msrb.gmra.mxu2 %vm326_vm2, %v2359_v58 }
  0xae   : > { %v543_v60 = vpop.permute.xlu1 %542 }
  0xaf   : > { %v557_v61 = vsel %vm330_vm0, %v543_v60, 0  ;;  %v541_v62 = vpop.permute.xlu0 %540 }
  0xb0   : > { %v546_v63 = vsel %vm544_vm5, %v541_v62, %v543_v60  ;;  %v545_v0 = vsel %vm544_vm5, %v539_v59, %v541_v62  ;;  %592 = vmatpush.bf16.msra.mxu3 %v557_v61 }
  0xb1   : > { %2356 = vmatmul.msk.bf16.vlgmr.msrb.gmra.mxu0 %vm326_vm2, %v2354_v46  ;;  %v554_v2 = vsel %vm330_vm0, %v546_v63, 0  ;;  %v551_v3 = vsel %vm330_vm0, %v545_v0, 0  ;;  %v733_v16 = vpop.permute.xlu2 %732 }
  0xb2   : > { %2361 = vmatmul.msk.bf16.vlgmr.msrb.gmra.mxu3 %vm326_vm2, %v2359_v58  ;;  %566 = vmatpush.bf16.msra.mxu1 %v551_v3  ;;  %v747_v24 = vsel %vm330_vm0, %v733_v16, 0 }
  0xb3   : > { %579 = vmatpush.bf16.msra.mxu2 %v554_v2 }
  0xb4   : > { %689 = vmatpush.bf16.msrb.mxu3 %v676_v1 }
  0xb7   : > { %v614_v6 = vpop.permute.xlu0 %613 }
  0xb8   : > { %v628_v7 = vsel %vm330_vm0, %v614_v6, 0  ;;  %v617_v8 = vsel %vm615_vm6, %v612_v4, %v614_v6  ;;  %v610_v9 = vpop.permute.xlu1 %609 }
  0xb9   : > { %2365 = vmatmul.msk.bf16.vlgmr.msra.gmra.mxu1 %vm326_vm2, %v2364_v5  ;;  %v625_v10 = vsel %vm330_vm0, %v617_v8, 0  ;;  %663 = vmatpush.bf16.msrb.mxu2 %v628_v7  ;;  %v616_v11 = vsel %vm615_vm6, %v610_v9, %v612_v4 }
  0xba   : > { %650 = vmatpush.bf16.msrb.mxu1 %v625_v10  ;;  %v622_v13 = vsel %vm330_vm0, %v616_v11, 0  ;;  %v796_v25 = vpop.permute.xlu2 %795 }
  0xbb   : > { %2366 = vmatmul.msk.bf16.vlgmr.msra.gmra.mxu2 %vm326_vm2, %v2364_v5  ;;  %637 = vmatpush.bf16.msrb.mxu0 %v622_v13 }
  0xbe   : > { %715 = vmatpush.bf16.msra.mxu1 %v680_v12 }
  0xc1   : > { %2362 = vmatmul.msk.bf16.vlgmr.msra.gmra.mxu0 %vm326_vm2, %v2359_v58 }
  0xc2   : > { %2367 = vmatmul.msk.bf16.vlgmr.msra.gmra.mxu3 %vm326_vm2, %v2364_v5  ;;  %702 = vmatpush.bf16.msra.mxu0 %v678_v14 }
  0xc4   : > { %v865_v34 = vpop.permute.xlu2 %864 }
  0xc9   : > { %2370 = vmatmul.msk.bf16.vlgmr.msrb.gmra.mxu1 %vm326_vm2, %v2368_v15  ;;  %v731_v17 = vpop.permute.xlu1 %730 }
  0xca   : > { %v729_v18 = vpop.permute.xlu0 %728  ;;  %v736_v19 = vsel %vm734_vm7, %v731_v17, %v733_v16 }
  0xcb   : > { %2371 = vmatmul.msk.bf16.vlgmr.msrb.gmra.mxu2 %vm326_vm2, %v2368_v15  ;;  %v735_v20 = vsel %vm734_vm7, %v729_v18, %v731_v17  ;;  %v744_v21 = vsel %vm330_vm0, %v736_v19, 0 }
  0xcc   : > { %v741_v22 = vsel %vm330_vm0, %v735_v20, 0  ;;  %769 = vmatpush.bf16.msra.mxu3 %v744_v21 }
  0xcd   : > { %756 = vmatpush.bf16.msra.mxu2 %v741_v22 }
  0xd1   : > { %2369 = vmatmul.msk.bf16.vlgmr.msrb.gmra.mxu0 %vm326_vm2, %v2368_v15 }
  0xd2   : > { %2372 = vmatmul.msk.bf16.vlgmr.msrb.gmra.mxu3 %vm326_vm2, %v306_v23  ;;  %v800_v26 = vpop.permute.xlu1 %799  ;;  %782 = vmatpush.bf16.msrb.mxu0 %v747_v24 }
  0xd3   : > { %v814_v27 = vsel %vm330_vm0, %v800_v26, 0  ;;  %v798_v28 = vpop.permute.xlu0 %797 }
  0xd4   : > { %v803_v29 = vsel %vm801_vm8, %v798_v28, %v800_v26  ;;  %v802_v30 = vsel %vm801_vm8, %v796_v25, %v798_v28  ;;  %849 = vmatpush.bf16.msrb.mxu3 %v814_v27 }
  0xd5   : > { %v811_v31 = vsel %vm330_vm0, %v803_v29, 0  ;;  %v808_v32 = vsel %vm330_vm0, %v802_v30, 0 }
  0xd6   : > { %823 = vmatpush.bf16.msrb.mxu1 %v808_v32  ;;  %836 = vmatpush.bf16.msrb.mxu2 %v811_v31 }
  0xd9   : > { %2374 = vmatmul.msk.bf16.vlgmr.msra.gmra.mxu1 %vm326_vm2, %v306_v23 }
  0xdb   : > { %2375 = vmatmul.msk.bf16.vlgmr.msra.gmra.mxu2 %vm326_vm2, %v2353_v33  ;;  %v867_v35 = vpop.permute.xlu0 %866  ;;  %v863_v36 = vpop.permute.xlu1 %862 }
  0xdc   : > { %v881_v37 = vsel %vm330_vm0, %v867_v35, 0  ;;  %v870_v38 = vsel %vm868_vm9, %v865_v34, %v867_v35  ;;  %v869_v39 = vsel %vm868_vm9, %v863_v36, %v865_v34 }
  0xdd   : > { %v878_v40 = vsel %vm330_vm0, %v870_v38, 0  ;;  %916 = vmatpush.bf16.msra.mxu2 %v881_v37  ;;  %v875_v41 = vsel %vm330_vm0, %v869_v39, 0 }
  0xde   : > { %903 = vmatpush.bf16.msra.mxu1 %v878_v40 }
  0xe1   : > { %2373 = vmatmul.msk.bf16.vlgmr.msra.gmra.mxu0 %vm326_vm2, %v306_v23 }
  0xe2   : > { %2376 = vmatmul.msk.bf16.vlgmr.msra.gmra.mxu3 %vm326_vm2, %v2353_v33  ;;  %890 = vmatpush.bf16.msra.mxu0 %v875_v41 }
  0xe9   : > { %2378 = vmatmul.msk.bf16.vlgmr.msrb.gmra.mxu1 %vm326_vm2, %v2358_v44 }
  0xeb   : > { %2379 = vmatmul.msk.bf16.vlgmr.msrb.gmra.mxu2 %vm326_vm2, %v2358_v44 }
  0xf1   : > { %2377 = vmatmul.msk.bf16.vlgmr.msrb.gmra.mxu0 %vm326_vm2, %v2353_v33 }
  0xf2   : > { %2380 = vmatmul.msk.bf16.vlgmr.msrb.gmra.mxu3 %vm326_vm2, %v2358_v44 }
  0xf9   : > { %2382 = vmatmul.msk.bf16.vlgmr.msra.gmra.mxu1 %vm326_vm2, %v2363_v45 }
  0xfb   : > { %2383 = vmatmul.msk.bf16.vlgmr.msra.gmra.mxu2 %vm326_vm2, %v2363_v45 }
 0x101   : > { %2381 = vmatmul.msk.bf16.vlgmr.msra.gmra.mxu0 %vm326_vm2, %v2363_v45 }
 0x116   : > { %v362_v46 = vpop.f32.mrf.mxu1 }
 0x11b   : > { %v375_v47 = vpop.f32.mrf.mxu2 }
 0x11e   : > { %v349_v48 = vpop.f32.mrf.mxu0  ;;  %v364_v49 = vpop.f32.mrf.mxu1 }
 0x123   : > { %v377_v50 = vpop.f32.mrf.mxu2 }
 0x125   : > { %v422_v51 = vpop.f32.mrf.mxu3 }
 0x126   : > { %v351_v52 = vpop.f32.mrf.mxu0  ;;  %v448_v53 = vpop.f32.mrf.mxu1 }
 0x12d   : > { %v424_v54 = vpop.f32.mrf.mxu3 }
 0x12e   : > { %v495_v55 = vpop.f32.mrf.mxu2  ;;  %v435_v56 = vpop.f32.mrf.mxu0 }
 0x12f   : > { %v450_v57 = vpop.f32.mrf.mxu1 }
 0x135   : > { %v508_v58 = vpop.f32.mrf.mxu3 }
 0x136   : > { %v497_v59 = vpop.f32.mrf.mxu2  ;;  %v437_v60 = vpop.f32.mrf.mxu0 }
 0x137   : > { %v568_v61 = vpop.f32.mrf.mxu1 }
 0x13d   : > { %v510_v62 = vpop.f32.mrf.mxu3 }
 0x13e   : > { %v581_v63 = vpop.f32.mrf.mxu2  ;;  %v521_v0 = vpop.f32.mrf.mxu0 }
 0x13f   : > { %v570_v1 = vpop.f32.mrf.mxu1 }
 0x145   : > { %v594_v2 = vpop.f32.mrf.mxu3 }
 0x146   : > { %v583_v3 = vpop.f32.mrf.mxu2  ;;  %v523_v4 = vpop.f32.mrf.mxu0 }
 0x147   : > { %v652_v5 = vpop.f32.mrf.mxu1 }
 0x14d   : > { %v596_v6 = vpop.f32.mrf.mxu3 }
 0x14e   : > { %v665_v7 = vpop.f32.mrf.mxu2  ;;  %v639_v8 = vpop.f32.mrf.mxu0 }
 0x14f   : > { %v654_v9 = vpop.f32.mrf.mxu1 }
 0x155   : > { %v691_v10 = vpop.f32.mrf.mxu3 }
 0x156   : > { %v667_v11 = vpop.f32.mrf.mxu2  ;;  %v641_v12 = vpop.f32.mrf.mxu0  ;;  %v692_v17 = vadd.f32 %v691_v10, %v349_v48 }
 0x157   : > { %v717_v13 = vpop.f32.mrf.mxu1 }
 0x158   : > { %v718_v28 = vadd.f32 %v717_v13, %v375_v47 }
 0x15d   : > { %v693_v14 = vpop.f32.mrf.mxu3 }
 0x15e   : > { %v758_v15 = vpop.f32.mrf.mxu2  ;;  %v704_v16 = vpop.f32.mrf.mxu0 }
 0x15f   : > { %v759_v18 = vadd.f32 %v758_v15, %v422_v51  ;;  %v719_v19 = vpop.f32.mrf.mxu1  ;;  %v705_v37 = vadd.f32 %v704_v16, %v362_v46  ;;  %v946_v46 = vld [vmem:[%s3186_s7] sm:$0x7] }
 0x161   : > { %v922_v20 = vadd.f32 %v759_v18, %v692_v17 }
 0x165   : > { %v771_v21 = vpop.f32.mrf.mxu3 }
 0x166   : > { %v760_v22 = vpop.f32.mrf.mxu2  ;;  %v706_v23 = vpop.f32.mrf.mxu0  ;;  %v772_v33 = vadd.f32 %v771_v21, %v435_v56 }
 0x167   : > { %v825_v24 = vpop.f32.mrf.mxu1 }
 0x168   : > { %v923_v40 = vadd.f32 %v772_v33, %v705_v37  ;;  %v826_v44 = vadd.f32 %v825_v24, %v495_v55  ;;  %v948_v55 = vperm.slane %v946_v46, 0 }
 0x16d   : > { %v773_v25 = vpop.f32.mrf.mxu3 }
 0x16e   : > { %v838_v26 = vpop.f32.mrf.mxu2  ;;  %v784_v27 = vpop.f32.mrf.mxu0 }
 0x16f   : > { %v785_v29 = vadd.f32 %v784_v27, %v448_v53  ;;  %v827_v30 = vpop.f32.mrf.mxu1  ;;  %v839_v38 = vadd.f32 %v838_v26, %v508_v58  ;;  %v938_v53 = vpop.permute.xlu0 %937 }
 0x171   : > { %v924_v31 = vadd.f32 %v785_v29, %v718_v28 }
 0x175   : > { %v851_v32 = vpop.f32.mrf.mxu3 }
 0x176   : > { %v840_v34 = vpop.f32.mrf.mxu2  ;;  %v786_v35 = vpop.f32.mrf.mxu0  ;;  %v852_v49 = vadd.f32 %v851_v32, %v521_v0 }
 0x177   : > { %v905_v36 = vpop.f32.mrf.mxu1 }
 0x178   : > { %v906_v39 = vadd.f32 %v905_v36, %v581_v63  ;;  %v949_v63 = vperm.slane %v946_v46, 1 }
 0x17a   : > { %v926_v41 = vadd.f32 %v906_v39, %v839_v38 }
 0x17c   : > { %v929_v42 = vadd.f32 %v926_v41, %v923_v40 }
 0x17d   : > { %v853_v43 = vpop.f32.mrf.mxu3 }
 0x17e   : > { %v918_v45 = vpop.f32.mrf.mxu2  ;;  %v892_v48 = vpop.f32.mrf.mxu0  ;;  %v932_v50 = vadd.f32 %v929_v42, %v652_v5 }
 0x17f   : > { %v919_v47 = vadd.f32 %v918_v45, %v594_v2  ;;  %v893_v51 = vadd.f32 %v892_v48, %v568_v61  ;;  %v907_v52 = vpop.f32.mrf.mxu1  ;;  %v950_v2 = vperm.slane %v946_v46, 2 }
 0x180   : > { %v941_v58 = vadd.f32 %v938_v53, %v932_v50  ;;  %v2868_v52 = vld [vmem:[%s2691_s21] sm:$0x3f] }
 0x181   : > { %v927_v54 = vadd.f32 %v919_v47, %v852_v49  ;;  %v925_v56 = vadd.f32 %v893_v51, %v826_v44  ;;  %v1607_v49 = vld [vmem:[%s2691_s21] sm:$0x3f] }
 0x182   : > { %v944_v61 = vmax.f32 %v941_v58, 0.0 }
 0x183   : > { %v930_v57 = vadd.f32 %v927_v54, %v924_v31  ;;  %v928_v59 = vadd.f32 %v925_v56, %v922_v20 }
 0x184   : > { %v955_v9 = vmul.f32 %v949_v63, %v944_v61 }
 0x185   : > { %v933_v60 = vadd.f32 %v930_v57, %v665_v7  ;;  %v931_v62 = vadd.f32 %v928_v59, %v639_v8  ;;  %v2875_v57 = vld [vmem:[%s2691_s21] sm:$0x3f] }
 0x186   : > { %v920_v1 = vpop.f32.mrf.mxu2  ;;  %v894_v0 = vpop.f32.mrf.mxu0 }
 0x187   : > { %v942_v3 = vadd.f32 %v938_v53, %v933_v60  ;;  %v940_v4 = vadd.f32 %v938_v53, %v931_v62  ;;  %v2883_v60 = vld [vmem:[%s2691_s21] sm:$0x3f] }
 0x188   : > { %v1896_v0 = vld [vmem:[%s2691_s21] sm:$0x3f] }
 0x189   : > { %v945_v5 = vmax.f32 %v942_v3, 0.0  ;;  %v943_v6 = vmax.f32 %v940_v4, 0.0 }
 0x18b   : > { %v956_v10 = vmul.f32 %v950_v2, %v945_v5  ;;  %v954_v11 = vmul.f32 %v948_v55, %v943_v6 }
 0x18d   : > { %v958_v12 = vpack.c.bf16 %v956_v10, %v956_v10  ;;  %v957_v13 = vpack.c.bf16 %v955_v9, %v954_v11 }
 0x18f   : > { %v962_v7 = vrot.slane %v958_v12, 4  ;;  %v963_v8 = vrot.slane %v958_v12, 6  ;;  %v961_v14 = vrot.slane %v957_v13, 2 }
 0x191   : > { %v970_v15 = vsel %vm967_vm13, %v962_v7, %v963_v8  ;;  %v966_v16 = vsel %vm330_vm0, %v957_v13, %v961_v14  ;;  %v2384_v13 = vld [vmem:[%s3182_s3 + $0x2] sm:$0x3] }
 0x192   : > { %v972_v17 = vsel %vm971_vm14, %v966_v16, %v970_v15 }
 0x193   : > { %978 = vst.msk [vmem:[#allocation2] sm:$0x3f] %vm977_vm15, %v972_v17 }
 0x19a   : > { %v979_v18 = vld [vmem:[#allocation2] sm:$0x3f] }
 0x19b   : > { %984 = vst [vmem:[#allocation1] ss:$4 sm:$0xff] %v979_v18  ;;  %v1050_v21 = vld [vmem:[#allocation2] sm:$0x3f] }
 0x19c   : > { %v1122_v25 = vld [vmem:[#allocation2] sm:$0x3f] }
 0x19d   : > { %v1194_v29 = vld [vmem:[#allocation2] sm:$0x3f] }
 0x19e   : > { %v1266_v33 = vld [vmem:[#allocation2] sm:$0x3f] }
 0x1a2   : > { %v987_v19 = vld.sshfl [vmem:[#allocation1 + $0x8] sm:$0xff pattern:$0x73625140]  ;;  %v985_v20 = vld.sshfl [vmem:[#allocation1] sm:$0xff pattern:$0x73625140] }
 0x1a3   : > { %993 = vrot.lane.b32.xlu2 %v987_v19, %s2579_s22  ;;  %991 = vrot.lane.b32.xlu1 %v985_v20, %s2579_s22  ;;  %v989_v22 = vld.sshfl [vmem:[#allocation1 + $0x10] sm:$0xff pattern:$0x73625140] }
 0x1a4   : > { %1056 = vst [vmem:[#allocation1] ss:$4 sm:$0xff] %v1050_v21 }
 0x1ab   : > { %995 = vrot.lane.b32.xlu1 %v989_v22, %s2579_s22  ;;  %v1061_v23 = vld.sshfl [vmem:[#allocation1 + $0x10] sm:$0xff pattern:$0x73625140]  ;;  %v1059_v24 = vld.sshfl [vmem:[#allocation1 + $0x8] sm:$0xff pattern:$0x73625140] }
 0x1ac   : > { %1067 = vrot.lane.b32.xlu0 %v1061_v23, %s2580_s23  ;;  %1065 = vrot.lane.b32.xlu2 %v1059_v24, %s2580_s23  ;;  %v1057_v26 = vld.sshfl [vmem:[#allocation1] sm:$0xff pattern:$0x73625140]  ;;  %s2588_s22 = smov 89  }
 0x1ad   : > { %1128 = vst [vmem:[#allocation1] ss:$4 sm:$0xff] %v1122_v25 }
 0x1b3   : > { %1063 = vrot.lane.b32.xlu1 %v1057_v26, %s2580_s23  ;;  %s2589_s23 = smov 72  }
 0x1b4   : > { %v1133_v27 = vld.sshfl [vmem:[#allocation1 + $0x10] sm:$0xff pattern:$0x73625140]  ;;  %v1131_v28 = vld.sshfl [vmem:[#allocation1 + $0x8] sm:$0xff pattern:$0x73625140] }
 0x1b5   : > { %1139 = vrot.lane.b32.xlu2 %v1133_v27, %s2581_s24  ;;  %1137 = vrot.lane.b32.xlu0 %v1131_v28, %s2581_s24  ;;  %v1129_v30 = vld.sshfl [vmem:[#allocation1] sm:$0xff pattern:$0x73625140] }
 0x1b6   : > { %1200 = vst [vmem:[#allocation1] ss:$4 sm:$0xff] %v1194_v29 }
 0x1bb   : > { %1135 = vrot.lane.b32.xlu1 %v1129_v30, %s2581_s24  ;;  %v2389_v30 = vld [vmem:[%s3182_s3 + $0x6] sm:$0x3] }
 0x1bd   : > { %v1203_v31 = vld.sshfl [vmem:[#allocation1 + $0x8] sm:$0xff pattern:$0x73625140]  ;;  %v1201_v32 = vld.sshfl [vmem:[#allocation1] sm:$0xff pattern:$0x73625140] }
 0x1be   : > { %1209 = vrot.lane.b32.xlu0 %v1203_v31, %s2582_s25  ;;  %1207 = vrot.lane.b32.xlu2 %v1201_v32, %s2582_s25  ;;  %v1205_v34 = vld.sshfl [vmem:[#allocation1 + $0x10] sm:$0xff pattern:$0x73625140] }
 0x1bf   : > { %1270 = vst [vmem:[#allocation1] ss:$4 sm:$0xff] %v1266_v33 }
 0x1c6   : > { %1211 = vrot.lane.b32.xlu0 %v1205_v34, %s2582_s25  ;;  %v1273_v35 = vld.sshfl [vmem:[#allocation1 + $0x8] sm:$0xff pattern:$0x73625140]  ;;  %v1271_v36 = vld.sshfl [vmem:[#allocation1] sm:$0xff pattern:$0x73625140] }
 0x1c7   : > { %1279 = vrot.lane.b32.xlu2 %v1273_v35, %s2583_s26  ;;  %1277 = vrot.lane.b32.xlu1 %v1271_v36, %s2583_s26  ;;  %v1275_v37 = vld.sshfl [vmem:[#allocation1 + $0x10] sm:$0xff pattern:$0x73625140] }
 0x1c8   : > { %1336 = vst [vmem:[#allocation1] ss:$4 sm:$0xff] %v979_v18 }
 0x1cf   : > { %1281 = vrot.lane.b32.xlu1 %v1275_v37, %s2583_s26  ;;  %v2852_v38 = vld.sshfl [vmem:[#allocation1] sm:$0xff pattern:$0x73625140]  ;;  %v2854_v39 = vld.sshfl [vmem:[#allocation1 + $0x8] sm:$0xff pattern:$0x73625140] }
 0x1d0   : > { %v2856_v40 = vld.sshfl [vmem:[#allocation1 + $0x10] sm:$0xff pattern:$0x73625140] }
 0x1d1   : > { %1388 = vst [vmem:[#allocation1] ss:$4 sm:$0xff] %v1050_v21 }
 0x1d8   : > { %v1393_v41 = vld.sshfl [vmem:[#allocation1 + $0x10] sm:$0xff pattern:$0x73625140]  ;;  %v1391_v42 = vld.sshfl [vmem:[#allocation1 + $0x8] sm:$0xff pattern:$0x73625140] }
 0x1d9   : > { %1399 = vrot.lane.b32.xlu2 %v1393_v41, %s2584_s10  ;;  %1397 = vrot.lane.b32.xlu0 %v1391_v42, %s2584_s10  ;;  %v1389_v43 = vld.sshfl [vmem:[#allocation1] sm:$0xff pattern:$0x73625140] }
 0x1da   : > { %1395 = vrot.lane.b32.xlu1 %v1389_v43, %s2584_s10  ;;  %1454 = vst [vmem:[#allocation1] ss:$4 sm:$0xff] %v1122_v25  ;;  %v2394_v43 = vld [vmem:[%s3182_s3 + $0xa] sm:$0x3] }
 0x1e1   : > { %v1457_v44 = vld.sshfl [vmem:[#allocation1 + $0x8] sm:$0xff pattern:$0x73625140]  ;;  %v1455_v45 = vld.sshfl [vmem:[#allocation1] sm:$0xff pattern:$0x73625140] }
 0x1e2   : > { %1463 = vrot.lane.b32.xlu0 %v1457_v44, %s2585_s12  ;;  %1461 = vrot.lane.b32.xlu2 %v1455_v45, %s2585_s12  ;;  %v1459_v48 = vld.sshfl [vmem:[#allocation1 + $0x10] sm:$0xff pattern:$0x73625140] }
 0x1e3   : > { %1520 = vst [vmem:[#allocation1] ss:$4 sm:$0xff] %v1194_v29 }
 0x1ea   : > { %1465 = vrot.lane.b32.xlu0 %v1459_v48, %s2585_s12  ;;  %v1523_v47 = vld.sshfl [vmem:[#allocation1 + $0x8] sm:$0xff pattern:$0x73625140]  ;;  %v1521_v50 = vld.sshfl [vmem:[#allocation1] sm:$0xff pattern:$0x73625140] }
 0x1eb   : > { %1529 = vrot.lane.b32.xlu2 %v1523_v47, %s2586_s13  ;;  %1527 = vrot.lane.b32.xlu1 %v1521_v50, %s2586_s13  ;;  %v1525_v51 = vld.sshfl [vmem:[#allocation1 + $0x10] sm:$0xff pattern:$0x73625140] }
 0x1ec   : > { %1612 = vst [vmem:[#allocation1] ss:$4 sm:$0xff] %v1607_v49 }
 0x1f3   : > { %1531 = vrot.lane.b32.xlu1 %v1525_v51, %s2586_s13  ;;  %v1617_v53 = vld.sshfl [vmem:[#allocation1 + $0x10] sm:$0xff pattern:$0x73625140]  ;;  %v1613_v54 = vld.sshfl [vmem:[#allocation1] sm:$0xff pattern:$0x73625140] }
 0x1f4   : > { %1623 = vrot.lane.b32.xlu0 %v1617_v53, %s2581_s24  ;;  %v1615_v56 = vld.sshfl [vmem:[#allocation1 + $0x8] sm:$0xff pattern:$0x73625140]  ;;  %s296_s13 = sand.u32 1, %s2569_s28  }
 0x1f5   : > { %1684 = vst [vmem:[#allocation1] ss:$4 sm:$0xff] %v2868_v52  ;;  %1621 = vrot.lane.b32.xlu2 %v1615_v56, %s2581_s24 }
 0x1fb   : > { %1619 = vrot.lane.b32.xlu1 %v1613_v54, %s2581_s24  ;;  %s2590_s24 = smov 71  }
 0x1fc   : > { %v1687_v46 = vld.sshfl [vmem:[#allocation1 + $0x8] sm:$0xff pattern:$0x73625140]  ;;  %v1685_v58 = vld.sshfl [vmem:[#allocation1] sm:$0xff pattern:$0x73625140] }
 0x1fd   : > { %1693 = vrot.lane.b32.xlu0 %v1687_v46, %s2582_s25  ;;  %v1689_v59 = vld.sshfl [vmem:[#allocation1 + $0x10] sm:$0xff pattern:$0x73625140]  ;;  %v994_v1 = vpop.permute.xlu2 %993 }
 0x1fe   : > { %1756 = vst [vmem:[#allocation1] ss:$4 sm:$0xff] %v2875_v57  ;;  %1695 = vrot.lane.b32.xlu2 %v1689_v59, %s2582_s25  ;;  %v1345_v59 = vsel %vm330_vm0, %v2854_v39, 0 }
 0x203   : > { %1691 = vrot.lane.b32.xlu1 %v1685_v58, %s2582_s25 }
 0x205   : > { %v1759_v62 = vld.sshfl [vmem:[#allocation1 + $0x8] sm:$0xff pattern:$0x73625140]  ;;  %v1761_v55 = vld.sshfl [vmem:[#allocation1 + $0x10] sm:$0xff pattern:$0x73625140] }
 0x206   : > { %1765 = vrot.lane.b32.xlu0 %v1759_v62, %s2588_s22  ;;  %v1757_v63 = vld.sshfl [vmem:[#allocation1] sm:$0xff pattern:$0x73625140]  ;;  %v1066_v4 = vpop.permute.xlu2 %1065  ;;  %v2399_v62 = vld [vmem:[%s3182_s3 + $0xe] sm:$0x3] }
 0x207   : > { %1829 = vst [vmem:[#allocation1] ss:$4 sm:$0xff] %v2883_v60  ;;  %1763 = vrot.lane.b32.xlu2 %v1757_v63, %s2588_s22 }
 0x20e   : > { %1767 = vrot.lane.b32.xlu0 %v1761_v55, %s2588_s22  ;;  %v1830_v2 = vld.sshfl [vmem:[#allocation1] sm:$0xff pattern:$0x73625140]  ;;  %v1832_v3 = vld.sshfl [vmem:[#allocation1 + $0x8] sm:$0xff pattern:$0x73625140] }
 0x20f   : > { %v1834_v61 = vld.sshfl [vmem:[#allocation1 + $0x10] sm:$0xff pattern:$0x73625140]  ;;  %1836 = vrot.lane.b32.xlu1 %v1830_v2, %s2589_s23  ;;  %1838 = vrot.lane.b32.xlu2 %v1832_v3, %s2589_s23  ;;  %v1140_v16 = vpop.permute.xlu2 %1139  ;;  %v2245_v55 = vld [vmem:[%s3185_s6] sm:$0xf] }
 0x210   : > { %1900 = vst [vmem:[#allocation1] ss:$4 sm:$0xff] %v1896_v0  ;;  %v1153_v24 = vsel %vm330_vm0, %v1140_v16, 0  ;;  %v2403_v3 = vld [vmem:[%s3182_s3 + $0x10] sm:$0x3] }
 0x215   : > { %v992_v5 = vpop.permute.xlu1 %991 }
 0x216   : > { %v997_v6 = vsel %vm323_vm1, %v992_v5, %v994_v1 }
 0x217   : > { %v1905_v9 = vld.sshfl [vmem:[#allocation1 + $0x10] sm:$0xff pattern:$0x73625140]  ;;  %v1901_v10 = vld.sshfl [vmem:[#allocation1] sm:$0xff pattern:$0x73625140]  ;;  %1840 = vrot.lane.b32.xlu1 %v1834_v61, %s2589_s23 }
 0x218   : > { %1911 = vrot.lane.b32.xlu0 %v1905_v9, %s2590_s24  ;;  %v1903_v11 = vld.sshfl [vmem:[#allocation1 + $0x8] sm:$0xff pattern:$0x73625140]  ;;  %v1003_v12 = vsel %vm330_vm0, %v997_v6, 0  ;;  %v1208_v37 = vpop.permute.xlu2 %1207 }
 0x219   : > { %1967 = vst [vmem:[#allocation1] ss:$4 sm:$0xff] %v1607_v49  ;;  %1018 = vmatpush.bf16.msra.mxu3 %v1003_v12  ;;  %1909 = vrot.lane.b32.xlu2 %v1903_v11, %s2590_s24 }
 0x21c   : > { %2385 = vmatmul.msk.bf16.vlgmr.msra.gmra.mxu3 %vm326_vm2, %v2384_v13 }
 0x21d   : > { %v996_v7 = vpop.permute.xlu1 %995 }
 0x21e   : > { %v998_v8 = vsel %vm323_vm1, %v994_v1, %v996_v7  ;;  %v1009_v14 = vsel %vm330_vm0, %v996_v7, 0  ;;  %v1068_v15 = vpop.permute.xlu0 %1067  ;;  %vm1769_vm1 = vcmask 728064  }
 0x21f   : > { %v1006_v17 = vsel %vm330_vm0, %v998_v8, 0  ;;  %v1070_v18 = vsel %vm398_vm3, %v1066_v4, %v1068_v15  ;;  %v1081_v19 = vsel %vm330_vm0, %v1068_v15, 0  ;;  %1044 = vmatpush.bf16.msrb.mxu1 %v1009_v14  ;;  %1907 = vrot.lane.b32.xlu1 %v1901_v10, %s2590_s24  ;;  %v980_v14 = vld [vmem:[%s3182_s3] sm:$0x3]  ;;  %s2269_s24 = scalar_lea.sflag [#allocation4], %s296_s13 }
 0x220   : > { %v1970_v20 = vld.sshfl [vmem:[#allocation1 + $0x8] sm:$0xff pattern:$0x73625140]  ;;  %v1968_v21 = vld.sshfl [vmem:[#allocation1] sm:$0xff pattern:$0x73625140]  ;;  %1031 = vmatpush.bf16.msrb.mxu0 %v1006_v17 }
 0x221   : > { %1976 = vrot.lane.b32.xlu0 %v1970_v20, %s2585_s12  ;;  %v1972_v22 = vld.sshfl [vmem:[#allocation1 + $0x10] sm:$0xff pattern:$0x73625140]  ;;  %v1078_v23 = vsel %vm330_vm0, %v1070_v18, 0  ;;  %v1280_v51 = vpop.permute.xlu2 %1279 }
 0x222   : > { %2033 = vst [vmem:[#allocation1] ss:$4 sm:$0xff] %v2868_v52  ;;  %1103 = vmatpush.bf16.msrb.mxu3 %v1078_v23  ;;  %2387 = vmatmul.msk.bf16.vlgmr.msrb.gmra.mxu1 %vm326_vm2, %v2384_v13  ;;  %v2388_v23 = vld [vmem:[%s3182_s3 + $0x4] sm:$0x3] }
 0x223   : > { %2386 = vmatmul.msk.bf16.vlgmr.msrb.gmra.mxu0 %vm326_vm2, %v2384_v13  ;;  %1978 = vrot.lane.b32.xlu2 %v1972_v22, %s2585_s12 }
 0x224   : > { %1116 = vmatpush.bf16.msra.mxu0 %v1081_v19 }
 0x225   : > { %v1064_v25 = vpop.permute.xlu1 %1063 }
 0x226   : > { %1188 = vmatpush.bf16.msra.mxu3 %v1153_v24  ;;  %v1069_v26 = vsel %vm398_vm3, %v1064_v25, %v1066_v4  ;;  %vm1842_vm3 = vcmask 588800  }
 0x227   : > { %v1075_v27 = vsel %vm330_vm0, %v1069_v26, 0  ;;  %v1138_v28 = vpop.permute.xlu0 %1137  ;;  %1974 = vrot.lane.b32.xlu1 %v1968_v21, %s2585_s12  ;;  %s2459_s12 = smul.u32 12, %s2659_s9 }
 0x228   : > { %v1142_v29 = vsel %vm471_vm4, %v1138_v28, %v1140_v16  ;;  %1090 = vmatpush.bf16.msrb.mxu2 %v1075_v27 }
 0x229   : > { %v2036_v31 = vld.sshfl [vmem:[#allocation1 + $0x8] sm:$0xff pattern:$0x73625140]  ;;  %v2038_v32 = vld.sshfl [vmem:[#allocation1 + $0x10] sm:$0xff pattern:$0x73625140]  ;;  %s2280_s9 = scalar_lea.hbm %s3187_s8, %s2459_s12 }
 0x22a   : > { %2042 = vrot.lane.b32.xlu0 %v2036_v31, %s2591_s19  ;;  %v2034_v33 = vld.sshfl [vmem:[#allocation1] sm:$0xff pattern:$0x73625140]  ;;  %v1150_v34 = vsel %vm330_vm0, %v1142_v29, 0  ;;  %s2284_s23 = sshll.u32 %s2280_s9, 4  ;;  %s2285_s23 = int_to_ptr.hbm [resolvable:$true] %s2284_s23 }
 0x22b   : > { %2100 = vst [vmem:[#allocation1] ss:$4 sm:$0xff] %v2875_v57  ;;  %2390 = vmatmul.msk.bf16.vlgmr.msrb.gmra.mxu2 %vm326_vm2, %v2389_v30  ;;  %2040 = vrot.lane.b32.xlu2 %v2034_v33, %s2591_s19 }
 0x22c   : > { %1175 = vmatpush.bf16.msra.mxu2 %v1150_v34  ;;  %2391 = vmatmul.msk.bf16.vlgmr.msrb.gmra.mxu3 %vm326_vm2, %v2389_v30 }
 0x22d   : > { %v1136_v35 = vpop.permute.xlu1 %1135 }
 0x22e   : > { %v1141_v36 = vsel %vm471_vm4, %v1136_v35, %v1138_v28 }
 0x22f   : > { %v1147_v41 = vsel %vm330_vm0, %v1141_v36, 0  ;;  %v2393_v36 = vld [vmem:[%s3182_s3 + $0x8] sm:$0x3] }
 0x230   : > { %v1210_v42 = vpop.permute.xlu0 %1209  ;;  %1162 = vmatpush.bf16.msra.mxu1 %v1147_v41 }
 0x231   : > { %v1213_v44 = vsel %vm544_vm5, %v1208_v37, %v1210_v42 }
 0x232   : > { %2044 = vrot.lane.b32.xlu0 %v2038_v32, %s2591_s19  ;;  %v2101_v45 = vld.sshfl [vmem:[#allocation1] sm:$0xff pattern:$0x73625140]  ;;  %v2103_v48 = vld.sshfl [vmem:[#allocation1 + $0x8] sm:$0xff pattern:$0x73625140] }
 0x233   : > { %v2105_v49 = vld.sshfl [vmem:[#allocation1 + $0x10] sm:$0xff pattern:$0x73625140]  ;;  %v1219_v47 = vsel %vm330_vm0, %v1213_v44, 0  ;;  %2392 = vmatmul.msk.bf16.vlgmr.msra.gmra.mxu0 %vm326_vm2, %v2389_v30  ;;  %2395 = vmatmul.msk.bf16.vlgmr.msra.gmra.mxu1 %vm326_vm2, %v2394_v43  ;;  %v1400_v2 = vpop.permute.xlu2 %1399  ;;  %s2457_s19 = smul.u32 12, %s296_s13 }
 0x234   : > { %2166 = vst [vmem:[#allocation1] ss:$4 sm:$0xff] %v2883_v60  ;;  %1234 = vmatpush.bf16.msrb.mxu0 %v1219_v47  ;;  %2107 = vrot.lane.b32.xlu1 %v2101_v45, %s2583_s26  ;;  %v1343_v60 = vsel %vm330_vm0, %v2852_v38, 0  ;;  %v1347_v38 = vsel %vm330_vm0, %v2856_v40, 0  ;;  %v1413_v6 = vsel %vm330_vm0, %v1400_v2, 0 }
 0x235   : > { %2109 = vrot.lane.b32.xlu2 %v2103_v48, %s2583_s26  ;;  %v2398_v48 = vld [vmem:[%s3182_s3 + $0xc] sm:$0x3]  ;;  %s298_s22 = scalar_lea.vmem [#allocation3], %s2457_s19  ;;  %s2535_s19 = scalar_lea.hbm %s3187_s8, 24 }
 0x238   : > { %v1212_v50 = vpop.permute.xlu0 %1211 }
 0x239   : > { %v1214_v52 = vsel %vm544_vm5, %v1210_v42, %v1212_v50  ;;  %v1225_v53 = vsel %vm330_vm0, %v1212_v50, 0  ;;  %v1278_v54 = vpop.permute.xlu1 %1277 }
 0x23a   : > { %v1222_v56 = vsel %vm330_vm0, %v1214_v52, 0  ;;  %v1283_v57 = vsel %vm615_vm6, %v1278_v54, %v1280_v51  ;;  %1260 = vmatpush.bf16.msrb.mxu2 %v1225_v53 }
 0x23b   : > { %v2171_v46 = vld.sshfl [vmem:[#allocation1 + $0x10] sm:$0xff pattern:$0x73625140]  ;;  %v1289_v58 = vsel %vm330_vm0, %v1283_v57, 0  ;;  %1247 = vmatpush.bf16.msrb.mxu1 %v1222_v56  ;;  %2396 = vmatmul.msk.bf16.vlgmr.msra.gmra.mxu2 %vm326_vm2, %v2394_v43 }
 0x23c   : > { %2177 = vrot.lane.b32.xlu0 %v2171_v46, %s2592_s17  ;;  %1304 = vmatpush.bf16.msrb.mxu3 %v1289_v58  ;;  %v1462_v11 = vpop.permute.xlu2 %1461  ;;  %v2167_v8 = vld.sshfl [vmem:[#allocation1] sm:$0xff pattern:$0x73625140]  ;;  %v2169_v41 = vld.sshfl [vmem:[#allocation1 + $0x8] sm:$0xff pattern:$0x73625140] }
 0x23d   : > { %2397 = vmatmul.msk.bf16.vlgmr.msra.gmra.mxu3 %vm326_vm2, %v2394_v43  ;;  %2111 = vrot.lane.b32.xlu1 %v2105_v49, %s2583_s26  ;;  %s2529_s26 = sshra.s32 %s2285_s23, 4  ;;  %s2530_s26 = int_to_ptr.hbm [resolvable:$true] %s2529_s26 }
 0x23e   : > { %1356 = vmatpush.bf16.msra.mxu2 %v1343_v60  ;;  %2175 = vrot.lane.b32.xlu2 %v2169_v41, %s2592_s17  ;;  %s2531_s21 = scalar_lea.hbm %s2530_s26, 12  ;;  %p2536_p0 = scmp.lt.s32.totalorder %s2530_s26, %s3187_s8 }
 0x23f   : > { %p2532_p11 = scmp.ne.s32.totalorder %s2530_s26, %s2531_s21  ;;  %p2537_p1 = scmp.lt.s32.totalorder %s2535_s19, %s2531_s21 }
 0x240   : > { %1369 = vmatpush.bf16.msra.mxu3 %v1345_v59  ;;  %v2419_v59 = vld [vmem:[%s3184_s5 + $0x2] sm:$0x3] }
 0x241   : > { %v1282_v63 = vpop.permute.xlu1 %1281  ;;  %p2533_p12 = pnand %p2532_p11, %p2676_p5  ;;  %p2538_p2 = por %p2537_p1, %p2536_p0 }
 0x242   : > { %v1284_v1 = vsel %vm615_vm6, %v1280_v51, %v1282_v63  ;;  %v1295_v39 = vsel %vm330_vm0, %v1282_v63, 0 }
 0x243   : > { %v1292_v0 = vsel %vm330_vm0, %v1284_v1, 0  ;;  %1330 = vmatpush.bf16.msra.mxu1 %v1295_v39  ;;  %2400 = vmatmul.msk.bf16.vlgmr.msrb.gmra.mxu0 %vm326_vm2, %v2399_v62  ;;  %p2534_p13 = pneg %p2533_p12 }
 0x244   : > { %2248 = vperm.xlu0 %2513, %v2245_v55   ;;  %1317 = vmatpush.bf16.msra.mxu0 %v1292_v0 }
 0x245   : > { %2401 = vmatmul.msk.bf16.vlgmr.msrb.gmra.mxu1 %vm326_vm2, %v2399_v62  ;;  %2173 = vrot.lane.b32.xlu1 %v2167_v8, %s2592_s17  ;;  %v1530_v16 = vpop.permute.xlu2 %1529  ;;  %v2429_v8 = vld [vmem:[%s3184_s5 + $0xa] sm:$0x3]  ;;  %s2282_s17 = sshll.u32 %s298_s22, 4  ;;  %p2539_p3 = pnand %p2538_p2, %p2534_p13  ;;  %s2283_s17 = int_to_ptr.vmem [resolvable:$true] %s2282_s17 }
 0x248   : > { %1382 = vmatpush.bf16.msrb.mxu0 %v1347_v38 }
 0x24b   : > { %v1398_v61 = vpop.permute.xlu0 %1397  ;;  %2402 = vmatmul.msk.bf16.vlgmr.msrb.gmra.mxu2 %vm326_vm2, %v2399_v62 }
 0x24c   : > { %v1402_v4 = vsel %vm734_vm7, %v1398_v61, %v1400_v2  ;;  %v1396_v5 = vpop.permute.xlu1 %1395  ;;  %v2424_v2 = vld [vmem:[%s3184_s5 + $0x6] sm:$0x3] }
 0x24d   : > { %v1410_v9 = vsel %vm330_vm0, %v1402_v4, 0  ;;  %v1401_v10 = vsel %vm734_vm7, %v1396_v5, %v1398_v61  ;;  %2404 = vmatmul.msk.bf16.vlgmr.msrb.gmra.mxu3 %vm326_vm2, %v2403_v3  ;;  %v1598_v61 = vld [vmem:[%s3183_s4] sm:$0xf] }
 0x24e   : > { %v1407_v40 = vsel %vm330_vm0, %v1401_v10, 0  ;;  %1448 = vmatpush.bf16.msrb.mxu3 %v1413_v6  ;;  %1435 = vmatpush.bf16.msrb.mxu2 %v1410_v9 }
 0x24f   : > { %1422 = vmatpush.bf16.msrb.mxu1 %v1407_v40  ;;  %v1622_v29 = vpop.permute.xlu2 %1621  ;;  %1601 = vperm.xlu2 %2514, %v1598_v61  }
 0x253   : > { %2405 = vmatmul.msk.bf16.vlgmr.msra.gmra.mxu0 %vm326_vm2, %v2403_v3 }
 0x254   : > { %v1464_v12 = vpop.permute.xlu0 %1463 }
 0x255   : > { %v1467_v13 = vsel %vm801_vm8, %v1462_v11, %v1464_v12  ;;  %2406 = vmatmul.msk.bf16.vlgmr.msra.gmra.mxu1 %vm326_vm2, %v2403_v3 }
 0x256   : > { %v1473_v7 = vsel %vm330_vm0, %v1467_v13, 0 }
 0x257   : > { %1488 = vmatpush.bf16.msra.mxu0 %v1473_v7 }
 0x258   : > { %v1696_v49 = vpop.permute.xlu2 %1695 }
 0x259   : > { %v1709_v50 = vsel %vm330_vm0, %v1696_v49, 0 }
 0x25b   : > { %2407 = vmatmul.msk.bf16.vlgmr.msra.gmra.mxu2 %vm326_vm2, %v980_v14 }
 0x25c   : > { %v1466_v15 = vpop.permute.xlu0 %1465 }
 0x25d   : > { %v1468_v17 = vsel %vm801_vm8, %v1464_v12, %v1466_v15  ;;  %v1479_v18 = vsel %vm330_vm0, %v1466_v15, 0  ;;  %v1528_v19 = vpop.permute.xlu1 %1527  ;;  %2408 = vmatmul.msk.bf16.vlgmr.msra.gmra.mxu3 %vm326_vm2, %v980_v14 }
 0x25e   : > { %v1476_v20 = vsel %vm330_vm0, %v1468_v17, 0  ;;  %v1533_v21 = vsel %vm868_vm9, %v1528_v19, %v1530_v16  ;;  %1514 = vmatpush.bf16.msra.mxu2 %v1479_v18 }
 0x25f   : > { %v1539_v22 = vsel %vm330_vm0, %v1533_v21, 0  ;;  %1501 = vmatpush.bf16.msra.mxu1 %v1476_v20 }
 0x260   : > { %1554 = vmatpush.bf16.msra.mxu3 %v1539_v22 }
 0x261   : > { %v1764_v56 = vpop.permute.xlu2 %1763 }
 0x263   : > { %2409 = vmatmul.msk.bf16.vlgmr.msrb.gmra.mxu0 %vm326_vm2, %v980_v14 }
 0x265   : > { %v1532_v24 = vpop.permute.xlu1 %1531  ;;  %2410 = vmatmul.msk.bf16.vlgmr.msrb.gmra.mxu1 %vm326_vm2, %v2388_v23 }
 0x266   : > { %v1534_v25 = vsel %vm868_vm9, %v1530_v16, %v1532_v24  ;;  %v1545_v26 = vsel %vm330_vm0, %v1532_v24, 0  ;;  %v1624_v27 = vpop.permute.xlu0 %1623  ;;  %v2434_v24 = vld [vmem:[%s3184_s5 + $0xe] sm:$0x3] }
 0x267   : > { %v1542_v28 = vsel %vm330_vm0, %v1534_v25, 0  ;;  %1580 = vmatpush.bf16.msrb.mxu1 %v1545_v26  ;;  %v1626_v30 = vsel %vm471_vm4, %v1622_v29, %v1624_v27  ;;  %v1637_v37 = vsel %vm330_vm0, %v1624_v27, 0 }
 0x268   : > { %1567 = vmatpush.bf16.msrb.mxu0 %v1542_v28  ;;  %v1634_v31 = vsel %vm330_vm0, %v1626_v30, 0 }
 0x269   : > { %v1839_v62 = vpop.permute.xlu2 %1838 }
 0x26b   : > { %2411 = vmatmul.msk.bf16.vlgmr.msrb.gmra.mxu2 %vm326_vm2, %v2388_v23 }
 0x26d   : > { %2412 = vmatmul.msk.bf16.vlgmr.msrb.gmra.mxu3 %vm326_vm2, %v2388_v23  ;;  %v1620_v32 = vpop.permute.xlu1 %1619 }
 0x26e   : > { %v1625_v33 = vsel %vm471_vm4, %v1620_v32, %v1622_v29  ;;  %1659 = vmatpush.bf16.msrb.mxu3 %v1634_v31  ;;  %vm1913_vm4 = vcmask 580608  }
 0x26f   : > { %v1694_v34 = vpop.permute.xlu0 %1693  ;;  %v1631_v35 = vsel %vm330_vm0, %v1625_v33, 0 }
 0x270   : > { %1646 = vmatpush.bf16.msrb.mxu2 %v1631_v35  ;;  %v1698_v47 = vsel %vm544_vm5, %v1694_v34, %v1696_v49  ;;  %v2438_v49 = vld [vmem:[%s3184_s5 + $0x10] sm:$0x3] }
 0x271   : > { %v1706_v51 = vsel %vm330_vm0, %v1698_v47, 0 }
 0x273   : > { %2413 = vmatmul.msk.bf16.vlgmr.msra.gmra.mxu0 %vm326_vm2, %v2393_v36  ;;  %v1910_v4 = vpop.permute.xlu2 %1909 }
 0x274   : > { %1672 = vmatpush.bf16.msra.mxu0 %v1637_v37 }
 0x275   : > { %2414 = vmatmul.msk.bf16.vlgmr.msra.gmra.mxu1 %vm326_vm2, %v2393_v36  ;;  %v1692_v42 = vpop.permute.xlu1 %1691 }
 0x276   : > { %v1697_v43 = vsel %vm544_vm5, %v1692_v42, %v1694_v34  ;;  %vm2046_vm5 = vcmask 875520  }
 0x277   : > { %v1703_v44 = vsel %vm330_vm0, %v1697_v43, 0 }
 0x278   : > { %v1766_v45 = vpop.permute.xlu0 %1765  ;;  %1718 = vmatpush.bf16.msra.mxu1 %v1703_v44 }
 0x279   : > { %v1770_v46 = vsel %vm1769_vm1, %v1764_v56, %v1766_v45 }
 0x27a   : > { %v1776_v58 = vsel %vm330_vm0, %v1770_v46, 0 }
 0x27b   : > { %2415 = vmatmul.msk.bf16.vlgmr.msra.gmra.mxu2 %vm326_vm2, %v2393_v36 }
 0x27c   : > { %1731 = vmatpush.bf16.msra.mxu2 %v1706_v51 }
 0x27d   : > { %2416 = vmatmul.msk.bf16.vlgmr.msra.gmra.mxu3 %vm326_vm2, %v2398_v48  ;;  %v1979_v19 = vpop.permute.xlu2 %1978 }
 0x27e   : > { %1744 = vmatpush.bf16.msra.mxu3 %v1709_v50  ;;  %v1992_v26 = vsel %vm330_vm0, %v1979_v19, 0 }
 0x280   : > { %v1768_v52 = vpop.permute.xlu0 %1767 }
 0x281   : > { %v1771_v53 = vsel %vm1769_vm1, %v1766_v45, %v1768_v52  ;;  %v1837_v57 = vpop.permute.xlu1 %1836  ;;  %v1782_v60 = vsel %vm330_vm0, %v1768_v52, 0 }
 0x282   : > { %v1779_v54 = vsel %vm330_vm0, %v1771_v53, 0  ;;  %v1843_v1 = vsel %vm1842_vm3, %v1837_v57, %v1839_v62 }
 0x283   : > { %2417 = vmatmul.msk.bf16.vlgmr.msrb.gmra.mxu0 %vm326_vm2, %v2398_v48  ;;  %v1849_v0 = vsel %vm330_vm0, %v1843_v1, 0 }
 0x284   : > { %1791 = vmatpush.bf16.msrb.mxu0 %v1776_v58  ;;  %v1608_v58 = vld [vmem:[%s3184_s5] sm:$0x3] }
 0x285   : > { %2418 = vmatmul.msk.bf16.vlgmr.msrb.gmra.mxu1 %vm326_vm2, %v2398_v48  ;;  %v2041_v27 = vpop.permute.xlu2 %2040 }
 0x286   : > { %1804 = vmatpush.bf16.msrb.mxu1 %v1779_v54 }
 0x289   : > { %v1841_v55 = vpop.permute.xlu1 %1840 }
 0x28a   : > { %v1912_v63 = vpop.permute.xlu0 %1911  ;;  %v1844_v39 = vsel %vm1842_vm3, %v1839_v62, %v1841_v55  ;;  %v1855_v3 = vsel %vm330_vm0, %v1841_v55, 0 }
 0x28b   : > { %2420 = vmatmul.msk.bf16.vlgmr.msrb.gmra.mxu2 %vm326_vm2, %v2419_v59  ;;  %v1852_v38 = vsel %vm330_vm0, %v1844_v39, 0  ;;  %v1915_v6 = vsel %vm1913_vm4, %v1910_v4, %v1912_v63  ;;  %v1926_v15 = vsel %vm330_vm0, %v1912_v63, 0 }
 0x28c   : > { %1817 = vmatpush.bf16.msrb.mxu2 %v1782_v60  ;;  %v1923_v40 = vsel %vm330_vm0, %v1915_v6, 0 }
 0x28d   : > { %2421 = vmatmul.msk.bf16.vlgmr.msrb.gmra.mxu3 %vm326_vm2, %v2419_v59 }
 0x28e   : > { %1864 = vmatpush.bf16.msrb.mxu3 %v1849_v0 }
 0x28f   : > { %v2110_v41 = vpop.permute.xlu2 %2109 }
 0x291   : > { %v1908_v5 = vpop.permute.xlu1 %1907 }
 0x292   : > { %v1914_v9 = vsel %vm1913_vm4, %v1908_v5, %v1910_v4  ;;  %v2423_v4 = vld [vmem:[%s3184_s5 + $0x4] sm:$0x3] }
 0x293   : > { %2422 = vmatmul.msk.bf16.vlgmr.msra.gmra.mxu0 %vm326_vm2, %v2419_v59  ;;  %v1977_v10 = vpop.permute.xlu0 %1976  ;;  %v1920_v11 = vsel %vm330_vm0, %v1914_v9, 0 }
 0x294   : > { %1877 = vmatpush.bf16.msra.mxu0 %v1852_v38  ;;  %v1981_v23 = vsel %vm801_vm8, %v1977_v10, %v1979_v19 }
 0x295   : > { %2425 = vmatmul.msk.bf16.vlgmr.msra.gmra.mxu1 %vm326_vm2, %v2424_v2  ;;  %v1989_v25 = vsel %vm330_vm0, %v1981_v23, 0 }
 0x296   : > { %1890 = vmatpush.bf16.msra.mxu1 %v1855_v3 }
 0x298   : > { %v2176_v0 = vpop.permute.xlu2 %2175 }
 0x299   : > { %v1975_v14 = vpop.permute.xlu1 %1974 }
 0x29a   : > { %v1980_v16 = vsel %vm801_vm8, %v1975_v14, %v1977_v10 }
 0x29b   : > { %2426 = vmatmul.msk.bf16.vlgmr.msra.gmra.mxu2 %vm326_vm2, %v2424_v2  ;;  %v1986_v17 = vsel %vm330_vm0, %v1980_v16, 0  ;;  %v2428_v16 = vld [vmem:[%s3184_s5 + $0x8] sm:$0x3] }
 0x29c   : > { %1935 = vmatpush.bf16.msra.mxu2 %v1920_v11  ;;  %v2043_v18 = vpop.permute.xlu0 %2042 }
 0x29d   : > { %2427 = vmatmul.msk.bf16.vlgmr.msra.gmra.mxu3 %vm326_vm2, %v2424_v2  ;;  %v2047_v29 = vsel %vm2046_vm5, %v2041_v27, %v2043_v18 }
 0x29e   : > { %1948 = vmatpush.bf16.msra.mxu3 %v1923_v40  ;;  %v2053_v35 = vsel %vm330_vm0, %v2047_v29, 0 }
 0x29f   : > { %v3035_v12 = vpop.f32.mrf.mxu3  ;;  %v3037_v13 = vpop.f32.mrf.mxu1 }
 0x2a0   : > { %v3039_v7 = vpop.f32.mrf.mxu0 }
 0x2a3   : > { %2430 = vmatmul.msk.bf16.vlgmr.msrb.gmra.mxu0 %vm326_vm2, %v2429_v8 }
 0x2a4   : > { %1961 = vmatpush.bf16.msrb.mxu0 %v1926_v15  ;;  %v2045_v28 = vpop.permute.xlu0 %2044 }
 0x2a5   : > { %2431 = vmatmul.msk.bf16.vlgmr.msrb.gmra.mxu1 %vm326_vm2, %v2429_v8  ;;  %v2048_v32 = vsel %vm2046_vm5, %v2043_v18, %v2045_v28  ;;  %v2059_v47 = vsel %vm330_vm0, %v2045_v28, 0 }
 0x2a6   : > { %2001 = vmatpush.bf16.msrb.mxu1 %v1986_v17  ;;  %v2108_v36 = vpop.permute.xlu1 %2107  ;;  %v2056_v37 = vsel %vm330_vm0, %v2048_v32, 0 }
 0x2a7   : > { %v1022_v20 = vpop.f32.mrf.mxu3  ;;  %v1048_v21 = vpop.f32.mrf.mxu1  ;;  %v2113_v48 = vsel %vm615_vm6, %v2108_v36, %v2110_v41 }
 0x2a8   : > { %v1035_v22 = vpop.f32.mrf.mxu0  ;;  %v2119_v50 = vsel %vm330_vm0, %v2113_v48, 0 }
 0x2ab   : > { %2432 = vmatmul.msk.bf16.vlgmr.msrb.gmra.mxu2 %vm326_vm2, %v2429_v8 }
 0x2ac   : > { %2014 = vmatpush.bf16.msrb.mxu2 %v1989_v25 }
 0x2ad   : > { %2435 = vmatmul.msk.bf16.vlgmr.msrb.gmra.mxu3 %vm326_vm2, %v2434_v24 }
 0x2ae   : > { %2027 = vmatpush.bf16.msrb.mxu3 %v1992_v26  ;;  %v3057_v30 = vpop.f32.mrf.mxu2  ;;  %v2178_v39 = vpop.permute.xlu0 %2177 }
 0x2af   : > { %v3059_v31 = vpop.f32.mrf.mxu3  ;;  %v2112_v51 = vpop.permute.xlu1 %2111  ;;  %v2192_v9 = vsel %vm330_vm0, %v2178_v39, 0 }
 0x2b0   : > { %v3061_v33 = vpop.f32.mrf.mxu0  ;;  %v3063_v34 = vpop.f32.mrf.mxu1  ;;  %v2114_v52 = vsel %vm615_vm6, %v2110_v41, %v2112_v51  ;;  %v2125_v59 = vsel %vm330_vm0, %v2112_v51, 0  ;;  %vm2179_vm6 = vcmask 596992  }
 0x2b1   : > { %v2122_v57 = vsel %vm330_vm0, %v2114_v52, 0  ;;  %v2181_v38 = vsel %vm2179_vm6, %v2176_v0, %v2178_v39 }
 0x2b2   : > { %v2189_v5 = vsel %vm330_vm0, %v2181_v38, 0 }
 0x2b3   : > { %2436 = vmatmul.msk.bf16.vlgmr.msra.gmra.mxu0 %vm326_vm2, %v2434_v24 }
 0x2b4   : > { %2068 = vmatpush.bf16.msra.mxu0 %v2053_v35 }
 0x2b5   : > { %2437 = vmatmul.msk.bf16.vlgmr.msra.gmra.mxu1 %vm326_vm2, %v2434_v24 }
 0x2b6   : > { %2081 = vmatpush.bf16.msra.mxu1 %v2056_v37  ;;  %v1094_v42 = vpop.f32.mrf.mxu2 }
 0x2b7   : > { %v1107_v43 = vpop.f32.mrf.mxu3  ;;  %v2174_v1 = vpop.permute.xlu1 %2173 }
 0x2b8   : > { %v1120_v44 = vpop.f32.mrf.mxu0  ;;  %v1166_v45 = vpop.f32.mrf.mxu1  ;;  %v2180_v2 = vsel %vm2179_vm6, %v2174_v1, %v2176_v0 }
 0x2b9   : > { %v2186_v6 = vsel %vm330_vm0, %v2180_v2, 0  ;;  %vm2266_vm0 = vcmask 257024  }
 0x2bb   : > { %2439 = vmatmul.msk.bf16.vlgmr.msra.gmra.mxu2 %vm326_vm2, %v2438_v49 }
 0x2bc   : > { %2094 = vmatpush.bf16.msra.mxu2 %v2059_v47 }
 0x2bd   : > { %2440 = vmatmul.msk.bf16.vlgmr.msra.gmra.mxu3 %vm326_vm2, %v2438_v49 }
 0x2be   : > { %2134 = vmatpush.bf16.msra.mxu3 %v2119_v50  ;;  %v3078_v53 = vpop.f32.mrf.mxu2 }
 0x2c0   : > { %v3080_v54 = vpop.f32.mrf.mxu3  ;;  %v3082_v56 = vpop.f32.mrf.mxu0 }
 0x2c2   : > { %v3085_v46 = vpop.f32.mrf.mxu1 }
 0x2c3   : > { %2441 = vmatmul.msk.bf16.vlgmr.msrb.gmra.mxu0 %vm326_vm2, %v2438_v49 }
 0x2c4   : > { %2147 = vmatpush.bf16.msrb.mxu0 %v2122_v57 }
 0x2c5   : > { %2442 = vmatmul.msk.bf16.vlgmr.msrb.gmra.mxu1 %vm326_vm2, %v1608_v58 }
 0x2c6   : > { %2160 = vmatpush.bf16.msrb.mxu1 %v2125_v59  ;;  %v1179_v60 = vpop.f32.mrf.mxu2 }
 0x2c8   : > { %v1192_v62 = vpop.f32.mrf.mxu3  ;;  %v1238_v55 = vpop.f32.mrf.mxu0 }
 0x2ca   : > { %v1251_v63 = vpop.f32.mrf.mxu1 }
 0x2cb   : > { %2443 = vmatmul.msk.bf16.vlgmr.msrb.gmra.mxu2 %vm326_vm2, %v1608_v58 }
 0x2cc   : > { %2201 = vmatpush.bf16.msrb.mxu2 %v2186_v6 }
 0x2cd   : > { %2444 = vmatmul.msk.bf16.vlgmr.msrb.gmra.mxu3 %vm326_vm2, %v1608_v58 }
 0x2ce   : > { %v1262_v3 = vpop.f32.mrf.mxu2  ;;  %2214 = vmatpush.bf16.msrb.mxu3 %v2189_v5 }
 0x2d0   : > { %v3095_v61 = vpop.f32.mrf.mxu3  ;;  %v3103_v10 = vpop.f32.mrf.mxu0 }
 0x2d2   : > { %v1332_v40 = vpop.f32.mrf.mxu1 }
 0x2d3   : > { %2445 = vmatmul.msk.bf16.vlgmr.msra.gmra.mxu0 %vm326_vm2, %v2423_v4 }
 0x2d4   : > { %2227 = vmatpush.bf16.msra.mxu0 %v2192_v9 }
 0x2d5   : > { %2446 = vmatmul.msk.bf16.vlgmr.msra.gmra.mxu1 %vm326_vm2, %v2423_v4 }
 0x2d6   : > { %v1264_v11 = vpop.f32.mrf.mxu2 }
 0x2d8   : > { %v1308_v8 = vpop.f32.mrf.mxu3  ;;  %v1321_v14 = vpop.f32.mrf.mxu0 }
 0x2da   : > { %v1334_v15 = vpop.f32.mrf.mxu1 }
 0x2db   : > { %2447 = vmatmul.msk.bf16.vlgmr.msra.gmra.mxu2 %vm326_vm2, %v2423_v4 }
 0x2dd   : > { %2448 = vmatmul.msk.bf16.vlgmr.msra.gmra.mxu3 %vm326_vm2, %v2428_v16 }
 0x2de   : > { %v1358_v17 = vpop.f32.mrf.mxu2 }
 0x2df   : > { %v1359_v19 = vadd.f32 %v1358_v17, %v3035_v12  ;;  %v2433_v12 = vld [vmem:[%s3184_s5 + $0xc] sm:$0x3] }
 0x2e0   : > { %v1371_v18 = vpop.f32.mrf.mxu3  ;;  %v1384_v21 = vpop.f32.mrf.mxu0 }
 0x2e1   : > { %v1372_v20 = vadd.f32 %v1371_v18, %v3039_v7  ;;  %v1385_v22 = vadd.f32 %v1384_v21, %v3037_v13 }
 0x2e2   : > { %v1424_v23 = vpop.f32.mrf.mxu1 }
 0x2e3   : > { %v1425_v24 = vadd.f32 %v1424_v23, %v3057_v30  ;;  %2449 = vmatmul.msk.bf16.vlgmr.msrb.gmra.mxu0 %vm326_vm2, %v2428_v16 }
 0x2e5   : > { %v1586_v25 = vadd.f32 %v1425_v24, %v1359_v19  ;;  %2450 = vmatmul.msk.bf16.vlgmr.msrb.gmra.mxu1 %vm326_vm2, %v2428_v16 }
 0x2e6   : > { %v1360_v26 = vpop.f32.mrf.mxu2 }
 0x2e8   : > { %v1373_v27 = vpop.f32.mrf.mxu3  ;;  %v1386_v28 = vpop.f32.mrf.mxu0 }
 0x2ea   : > { %v1426_v29 = vpop.f32.mrf.mxu1 }
 0x2eb   : > { %2451 = vmatmul.msk.bf16.vlgmr.msrb.gmra.mxu2 %vm326_vm2, %v2433_v12 }
 0x2ed   : > { %2452 = vmatmul.msk.bf16.vlgmr.msrb.gmra.mxu3 %vm326_vm2, %v2433_v12 }
 0x2ee   : > { %v1437_v13 = vpop.f32.mrf.mxu2 }
 0x2ef   : > { %v1438_v30 = vadd.f32 %v1437_v13, %v3059_v31 }
 0x2f0   : > { %v1450_v7 = vpop.f32.mrf.mxu3  ;;  %v1490_v35 = vpop.f32.mrf.mxu0 }
 0x2f1   : > { %v1451_v32 = vadd.f32 %v1450_v7, %v3061_v33  ;;  %v1491_v36 = vadd.f32 %v1490_v35, %v3063_v34  ;;  %v1587_v41 = vadd.f32 %v1438_v30, %v1372_v20 }
 0x2f2   : > { %v1503_v37 = vpop.f32.mrf.mxu1 }
 0x2f3   : > { %v1588_v42 = vadd.f32 %v1451_v32, %v1385_v22  ;;  %v1504_v43 = vadd.f32 %v1503_v37, %v3078_v53  ;;  %2453 = vmatmul.msk.bf16.vlgmr.msra.gmra.mxu0 %vm326_vm2, %v2433_v12 }
 0x2f6   : > { %v1439_v44 = vpop.f32.mrf.mxu2 }
 0x2f8   : > { %v1452_v45 = vpop.f32.mrf.mxu3  ;;  %v1492_v48 = vpop.f32.mrf.mxu0 }
 0x2fa   : > { %v1505_v49 = vpop.f32.mrf.mxu1 }
 0x2fe   : > { %v1516_v47 = vpop.f32.mrf.mxu2 }
 0x2ff   : > { %v1517_v31 = vadd.f32 %v1516_v47, %v3080_v54 }
 0x300   : > { %v1556_v50 = vpop.f32.mrf.mxu3  ;;  %v1569_v51 = vpop.f32.mrf.mxu0 }
 0x301   : > { %v1557_v33 = vadd.f32 %v1556_v50, %v3082_v56  ;;  %v1570_v34 = vadd.f32 %v1569_v51, %v3085_v46 }
 0x302   : > { %v1582_v52 = vpop.f32.mrf.mxu1 }
 0x303   : > { %v1589_v57 = vadd.f32 %v1557_v33, %v1491_v36  ;;  %v1583_v58 = vadd.f32 %v1582_v52, %v1262_v3  ;;  %v1590_v59 = vadd.f32 %v1570_v34, %v1504_v43 }
 0x305   : > { %v1592_v53 = vadd.f32 %v1589_v57, %v1586_v25  ;;  %v1591_v60 = vadd.f32 %v1583_v58, %v1517_v31  ;;  %v1593_v62 = vadd.f32 %v1590_v59, %v1587_v41 }
 0x306   : > { %v1518_v54 = vpop.f32.mrf.mxu2 }
 0x307   : > { %v1594_v55 = vadd.f32 %v1591_v60, %v1588_v42  ;;  %v3132_v63 = vadd.f32 %v1592_v53, %v3095_v61  ;;  %v3135_v39 = vadd.f32 %v1593_v62, %v3103_v10 }
 0x308   : > { %v1558_v1 = vpop.f32.mrf.mxu3  ;;  %v1571_v0 = vpop.f32.mrf.mxu0 }
 0x309   : > { %v3137_v56 = vadd.f32 %v1594_v55, %v1332_v40 }
 0x30a   : > { %v1584_v46 = vpop.f32.mrf.mxu1 }
 0x30e   : > { %v1648_v38 = vpop.f32.mrf.mxu2 }
 0x310   : > { %v1661_v2 = vpop.f32.mrf.mxu3  ;;  %v1674_v3 = vpop.f32.mrf.mxu0 }
 0x312   : > { %v1720_v4 = vpop.f32.mrf.mxu1 }
 0x316   : > { %v1650_v5 = vpop.f32.mrf.mxu2 }
 0x318   : > { %v1663_v6 = vpop.f32.mrf.mxu3  ;;  %v1676_v9 = vpop.f32.mrf.mxu0 }
 0x31a   : > { %v1722_v11 = vpop.f32.mrf.mxu1 }
 0x31e   : > { %v1733_v8 = vpop.f32.mrf.mxu2 }
 0x320   : > { %v1746_v61 = vpop.f32.mrf.mxu3  ;;  %v1793_v14 = vpop.f32.mrf.mxu0 }
 0x322   : > { %v1806_v15 = vpop.f32.mrf.mxu1 }
 0x326   : > { %v1735_v16 = vpop.f32.mrf.mxu2 }
 0x327   : > { %v1602_v16 = vpop.permute.xlu2 %1601 }
 0x328   : > { %v1748_v10 = vpop.f32.mrf.mxu3  ;;  %v1795_v17 = vpop.f32.mrf.mxu0 }
 0x329   : > { %v2249_v17 = vpop.permute.xlu0 %2248 }
 0x32a   : > { %v1808_v18 = vpop.f32.mrf.mxu1 }
 0x32e   : > { %v1819_v40 = vpop.f32.mrf.mxu2 }
 0x330   : > { %v1866_v19 = vpop.f32.mrf.mxu3  ;;  %v1879_v20 = vpop.f32.mrf.mxu0 }
 0x332   : > { %v1892_v21 = vpop.f32.mrf.mxu1 }
 0x336   : > { %v1821_v22 = vpop.f32.mrf.mxu2 }
 0x338   : > { %v1868_v23 = vpop.f32.mrf.mxu3  ;;  %v1881_v24 = vpop.f32.mrf.mxu0 }
 0x33a   : > { %v1894_v25 = vpop.f32.mrf.mxu1 }
 0x33b   : > { %v1606_v25 = vadd.f32 %v1602_v16, %v3137_v56 }
 0x33e   : > { %v1937_v26 = vpop.f32.mrf.mxu2 }
 0x340   : > { %v1950_v27 = vpop.f32.mrf.mxu3  ;;  %v1963_v28 = vpop.f32.mrf.mxu0 }
 0x342   : > { %v2003_v29 = vpop.f32.mrf.mxu1 }
 0x343   : > { %v2004_v37 = vadd.f32 %v2003_v29, %v1648_v38 }
 0x346   : > { %v1939_v12 = vpop.f32.mrf.mxu2 }
 0x348   : > { %v1952_v13 = vpop.f32.mrf.mxu3  ;;  %v1965_v7 = vpop.f32.mrf.mxu0 }
 0x34a   : > { %v2005_v30 = vpop.f32.mrf.mxu1 }
 0x34e   : > { %v2016_v32 = vpop.f32.mrf.mxu2 }
 0x34f   : > { %v2017_v43 = vadd.f32 %v2016_v32, %v1661_v2 }
 0x350   : > { %v2029_v35 = vpop.f32.mrf.mxu3  ;;  %v2070_v36 = vpop.f32.mrf.mxu0 }
 0x351   : > { %v2071_v41 = vadd.f32 %v2070_v36, %v1720_v4  ;;  %v2030_v34 = vadd.f32 %v2029_v35, %v1674_v3 }
 0x352   : > { %v2083_v42 = vpop.f32.mrf.mxu1 }
 0x353   : > { %v2084_v44 = vadd.f32 %v2083_v42, %v1733_v8  ;;  %v2233_v45 = vadd.f32 %v2071_v41, %v2004_v37 }
 0x355   : > { %v2234_v48 = vadd.f32 %v2084_v44, %v2017_v43 }
 0x356   : > { %v2018_v49 = vpop.f32.mrf.mxu2 }
 0x358   : > { %v2031_v47 = vpop.f32.mrf.mxu3  ;;  %v2072_v50 = vpop.f32.mrf.mxu0 }
 0x35a   : > { %v2085_v31 = vpop.f32.mrf.mxu1 }
 0x35e   : > { %v2096_v33 = vpop.f32.mrf.mxu2 }
 0x35f   : > { %v2097_v52 = vadd.f32 %v2096_v33, %v1746_v61 }
 0x360   : > { %v2136_v51 = vpop.f32.mrf.mxu3  ;;  %v2149_v57 = vpop.f32.mrf.mxu0 }
 0x361   : > { %v2235_v59 = vadd.f32 %v2097_v52, %v2030_v34  ;;  %v2137_v0 = vadd.f32 %v2136_v51, %v1793_v14  ;;  %v2150_v46 = vadd.f32 %v2149_v57, %v1806_v15 }
 0x362   : > { %v2162_v58 = vpop.f32.mrf.mxu1 }
 0x363   : > { %v2163_v5 = vadd.f32 %v2162_v58, %v1819_v40  ;;  %v1604_v40 = vadd.f32 %v1602_v16, %v3132_v63 }
 0x366   : > { %v2098_v53 = vpop.f32.mrf.mxu2 }
 0x368   : > { %v2138_v60 = vpop.f32.mrf.mxu3  ;;  %v2151_v62 = vpop.f32.mrf.mxu0 }
 0x36a   : > { %v2164_v55 = vpop.f32.mrf.mxu1 }
 0x36e   : > { %v2203_v1 = vpop.f32.mrf.mxu2 }
 0x36f   : > { %v2204_v38 = vadd.f32 %v2203_v1, %v1866_v19 }
 0x370   : > { %v2216_v54 = vpop.f32.mrf.mxu3  ;;  %v2229_v4 = vpop.f32.mrf.mxu0 }
 0x371   : > { %v2217_v2 = vadd.f32 %v2216_v54, %v1879_v20  ;;  %v2230_v3 = vadd.f32 %v2229_v4, %v1892_v21  ;;  %v2236_v6 = vadd.f32 %v2204_v38, %v2137_v0  ;;  %v1605_v21 = vadd.f32 %v1602_v16, %v3135_v39 }
 0x373   : > { %v2237_v9 = vadd.f32 %v2217_v2, %v2150_v46  ;;  %v2238_v11 = vadd.f32 %v2230_v3, %v2163_v5  ;;  %v2239_v8 = vadd.f32 %v2236_v6, %v2233_v45 }
 0x375   : > { %v2240_v61 = vadd.f32 %v2237_v9, %v2234_v48  ;;  %v2241_v10 = vadd.f32 %v2238_v11, %v2235_v59  ;;  %v2242_v14 = vadd.f32 %v2239_v8, %v1937_v26 }
 0x376   : > { %v2205_v20 = vpop.f32.mrf.mxu2 }
 0x377   : > { %v2243_v18 = vadd.f32 %v2240_v61, %v1950_v27  ;;  %v2244_v15 = vadd.f32 %v2241_v10, %v1963_v28  ;;  %v2251_v22 = vadd.f32 %v2249_v17, %v2242_v14 }
 0x378   : > { %v2218_v19 = vpop.f32.mrf.mxu3  ;;  %v2231_v24 = vpop.f32.mrf.mxu0 }
 0x379   : > { %v2252_v23 = vadd.f32 %v2249_v17, %v2243_v18  ;;  %v2253_v29 = vadd.f32 %v2249_v17, %v2244_v15  ;;  %v2254_v12 = vadd.f32 %v2251_v22, %v1604_v40 }
 0x37b   : > { %v2255_v26 = vadd.f32 %v2252_v23, %v1605_v21  ;;  %v2256_v27 = vadd.f32 %v2253_v29, %v1606_v25  ;;  %v2257_v39 = vmax.f32 %v2254_v12, 0.0 }
 0x37d   : > { %v2258_v28 = vmax.f32 %v2255_v26, 0.0  ;;  %v2259_v63 = vmax.f32 %v2256_v27, 0.0 }
 0x37f   : > { %v2262_v13 = vrot.slane %v2258_v28, 4  ;;  %2267 = vst.msk [vmem:[%s298_s22 + $0x8] sm:$0xf] %vm2266_vm0, %v2259_v63 }
 0x381   : > { %v2263_v56 = vsel %vm971_vm14, %v2257_v39, %v2262_v13 }
 0x382   : > { %2265 = vst [vmem:[%s298_s22] sm:$0xff] %v2263_v56 }
 0x383   : > { %2542 = shalt.err (!%p2539_p3)
}
 0x384   : > { %2460 = dma.vmem_to_hbm [thread:$0]  (%p2676_p5), %s2283_s17, 192, %s2285_s23, %s2269_s24  }
 0x385 PF: > { %p2466_p4 = scmp.ge.s32.totalorder %s2577_s30, 2  ;;  %s2296_s13 = sand.u32 1, %s2565_s27  }
 0x386   : > { %s2297_s18 = scalar_lea.sflag [#allocation4], %s2296_s13 }
 0x387   : > { %p2463_p7 = pnand %p2466_p4, %p2680_p6 }
 0x389   : > { %p2464_p8 = pneg %p2463_p7 }
 0x38b   : > { %2560 = dma.done.wait (%p2464_p8), %s2297_s18, 192  }
 0x38c   : > { %2562 = vsyncadd (%p2464_p8), %s2297_s18, 4294967104  ;;  %p18_p9 = scmp.ge.s32.totalorder %s2663_s11, 4   ;;  %s3190_s27 = smov %s2569_s28 }
 0x38d   : > { %s3191_s28 = smov %s2573_s29  ;;  %s3192_s29 = smov %s2674_s14 }
 0x38e   : > { %s3193_s30 = smov %s2663_s11  ;;  %20 = sbr.rel (!%p18_p9) target bundleno = 3 (0x3), region = 111 }
 0x393   :  { %2303 = vsyncpa [#allocation4], 1 }
 0x394   :  { %2305 = vsyncpa [#allocation4 + $0x1], 1 }

</bundles_post_ra>
